<compile_context>
chip_gen: v7x
topology: tpu7x:2x2x1
jax: 0.10.0
libtpu: 0.0.40
codegen_flags: <defaults>
</compile_context>

<pallas_src>
import functools

import jax
import jax.numpy as jnp
from jax.experimental import pallas as pl
from jax.experimental.pallas import tpu as pltpu

HIDDEN = 64              # fixed by the module (hidden_size=64, num_layers=1)
GATES = 4 * HIDDEN       # 256: fused gate width [i|f|g|o] == two 128-lane vregs
STATE = 2 * HIDDEN       # 128: packed [h|c] state width == one vreg per 8 rows
SUBLANE = 8              # f32 sublane count; batch padded to a multiple of this
UNROLL_MAX = 16          # fully unroll chunks up to this many timesteps


def lstm_kernel(x_ref, wih_ref, whh_ref, b_ref, wfc_ref, bfc_ref,
                out_ref, xw_sc, state_sc, *, seq_len, batch_pad, t_chunk):
    chunk = pl.program_id(0)
    n_chunks = pl.num_programs(0)

    @pl.when(chunk == 0)
    def _init():
        state_sc[...] = jnp.zeros_like(state_sc)

    # ---- time-parallel pre-pass for this chunk: (T_c*B_pad, D) @ (D, 256) + bias ----
    xw_sc[...] = (jnp.dot(x_ref[...], wih_ref[...],
                          preferred_element_type=jnp.float32) + b_ref[...])

    whh = whh_ref[...]                      # (128, 256) bf16; rows 64:127 are zero
    is_h_lane = jax.lax.broadcasted_iota(
        jnp.int32, (batch_pad, STATE), 1) < HIDDEN    # lanes 0:63 == h / i / g half
    full_chunk = (seq_len % t_chunk) == 0
    t_base = chunk * t_chunk

    def step(t, s):
        # s: packed state [h | c], (B_pad, 128) f32, loop-carried in vregs.
        row = t * batch_pad
        if not isinstance(row, int):
            row = pl.multiple_of(row, batch_pad)
        xw_t = xw_sc[pl.ds(row, batch_pad), :]                    # (B_pad, 256)
        # c-lanes of s hit zero rows of whh, so this is exactly h @ W_hh^T.
        gates = xw_t + jnp.dot(s.astype(jnp.bfloat16), whh,
                               preferred_element_type=jnp.float32)
        pre_if = gates[:, :STATE]            # [i_pre | f_pre]  (whole-vreg slice)
        pre_go = gates[:, STATE:]            # [g_pre | o_pre]  (whole-vreg slice)
        # sigmoid(x) = 0.5*tanh(0.5*x)+0.5 -> all transcendentals on the EUP slot.
        sig_if = 0.5 * jnp.tanh(0.5 * pre_if) + 0.5               # [i | f]
        t_go = jnp.tanh(jnp.where(is_h_lane, pre_go, 0.5 * pre_go))
        act_go = jnp.where(is_h_lane, t_go, 0.5 * t_go + 0.5)     # [g | o]
        p_fc = sig_if * s                    # lanes 64:127 = f * c
        p_ig = sig_if * act_go               # lanes  0:63  = i * g
        # swap halves (XLU roll) to line i*g up with f*c -> c_new sits in lanes 64:127
        c_vec = p_fc + pltpu.roll(p_ig, shift=HIDDEN, axis=1)
        # o * tanh(c_new) lands in lanes 64:127 -> roll back into the h half
        h_vec = pltpu.roll(act_go * jnp.tanh(c_vec), shift=HIDDEN, axis=1)
        s_new = jnp.where(is_h_lane, h_vec, c_vec)                # [h_new | c_new]
        if full_chunk:
            return s_new
        # keep the state frozen on zero-padded timesteps of the last chunk
        return jnp.where(t_base + t < seq_len, s_new, s)

    s = state_sc[...]
    if t_chunk <= UNROLL_MAX:
        for t in range(t_chunk):             # short chunk: straight-line, static offsets
            s = step(t, s)
    else:
        s = jax.lax.fori_loop(0, t_chunk, step, s, unroll=8)
    state_sc[...] = s

    # ---- fc head on the final hidden state (last chunk only) ----
    @pl.when(chunk == n_chunks - 1)
    def _head():
        s_fin = state_sc[...]
        # c-lanes hit zero rows of wfc, so this is exactly h_T @ W_fc^T.
        out = jnp.dot(s_fin.astype(jnp.bfloat16), wfc_ref[...],
                      preferred_element_type=jnp.float32) + bfc_ref[...]
        out_ref[...] = out.astype(out_ref.dtype)


def prepare_params(params):
    """One-time weight packing: transpose, zero row-padding for the packed [h|c]
    state trick, bias fusion and bf16 cast. Done once, NOT per forward call."""
    H = HIDDEN
    num_classes = params["w_fc"].shape[0]
    w_ih_t = jnp.transpose(params["w_ih"]).astype(jnp.bfloat16)           # (D, 256)
    w_hh_t = (jnp.zeros((STATE, GATES), jnp.float32)
              .at[:H].set(jnp.transpose(params["w_hh"]))
              .astype(jnp.bfloat16))                                       # (128, 256)
    bias = (params["b_ih"] + params["b_hh"]).reshape(1, GATES).astype(jnp.float32)
    w_fc_t = (jnp.zeros((STATE, num_classes), jnp.float32)
              .at[:H].set(jnp.transpose(params["w_fc"]))
              .astype(jnp.bfloat16))                                       # (128, C)
    b_fc = params["b_fc"].reshape(1, num_classes).astype(jnp.float32)
    return {"w_ih_t": w_ih_t, "w_hh_t": w_hh_t, "bias": bias,
            "w_fc_t": w_fc_t, "b_fc": b_fc}


def lstm_model_forward(x, prepared, *, t_chunk=None):
    """x: (B, T, D) float32 (batch_first, like the PyTorch module). Returns (B, C)."""
    B, T, D = x.shape
    C = prepared["w_fc_t"].shape[1]
    B_pad = max(SUBLANE, ((B + SUBLANE - 1) // SUBLANE) * SUBLANE)

    # Time chunking bounds per-chunk VMEM (xw scratch + streamed x block), which is
    # what first breaks v7x's 64 MiB / v5e's small default scoped VMEM for long T.
    if t_chunk is None:
        t_chunk = max(1, min(T, 4096 // B_pad))
    num_chunks = pl.cdiv(T, t_chunk)
    T_pad = num_chunks * t_chunk

    # batch/time padded, time-major, flattened for the per-chunk prepass matmul
    x_tm = jnp.transpose(x, (1, 0, 2))                                     # (T, B, D)
    x_tm = jnp.pad(x_tm, ((0, T_pad - T), (0, B_pad - B), (0, 0)))
    x2d = x_tm.reshape(T_pad * B_pad, D).astype(jnp.bfloat16)

    kernel = functools.partial(lstm_kernel, seq_len=T, batch_pad=B_pad,
                               t_chunk=t_chunk)

    grid_spec = pltpu.PrefetchScalarGridSpec(
        num_scalar_prefetch=0,
        grid=(num_chunks,),                                 # sequential time chunks
        in_specs=[
            pl.BlockSpec((t_chunk * B_pad, D), lambda c: (c, 0)),   # x, streamed
            pl.BlockSpec((D, GATES), lambda c: (0, 0)),             # W_ih^T
            pl.BlockSpec((STATE, GATES), lambda c: (0, 0)),         # [W_hh^T; 0]
            pl.BlockSpec((1, GATES), lambda c: (0, 0)),             # fused bias
            pl.BlockSpec((STATE, C), lambda c: (0, 0)),             # [W_fc^T; 0]
            pl.BlockSpec((1, C), lambda c: (0, 0)),                 # b_fc
        ],
        out_specs=pl.BlockSpec((B_pad, C), lambda c: (0, 0)),
        scratch_shapes=[
            pltpu.VMEM((t_chunk * B_pad, GATES), jnp.float32),  # per-chunk x-projection
            pltpu.VMEM((B_pad, STATE), jnp.float32),            # persistent packed [h|c]
        ],
    )

    # modest, chip-safe VMEM budget (48 MiB cap is below every generation's physical VMEM)
    need = (2 * t_chunk * B_pad * D * 2                        # x block, double-buffered
            + t_chunk * B_pad * GATES * 4                      # xw scratch
            + 2 * (D + STATE) * GATES * 2 + 2 * STATE * C * 2  # weights (bf16, 2 bufs)
            + B_pad * (STATE + 2 * C) * 4 + (GATES + C) * 4)   # state / out / biases
    vmem_limit = int(min(max(need + (2 << 20), 16 << 20), 48 << 20))

    out_pad = pl.pallas_call(
        kernel,
        out_shape=jax.ShapeDtypeStruct((B_pad, C), jnp.float32),
        grid_spec=grid_spec,
        compiler_params=pltpu.CompilerParams(
            dimension_semantics=("arbitrary",),        # chunks carry state -> serial
            vmem_limit_bytes=vmem_limit),
    )(x2d, prepared["w_ih_t"], prepared["w_hh_t"], prepared["bias"],
      prepared["w_fc_t"], prepared["b_fc"])

    # TODO(synk): for large batches on v7x, add a leading "parallel" batch-chunk grid
    # axis so the (batch-parallel) recurrence is split across the two TensorCores.
    return out_pad[:B]


def lstm_model_reference(x, params):
    """Pure-JAX f32 reference matching torch.nn.LSTM + nn.Linear semantics."""
    B, T, D = x.shape
    H = HIDDEN
    b = params["b_ih"] + params["b_hh"]
    h = jnp.zeros((B, H), jnp.float32)
    c = jnp.zeros((B, H), jnp.float32)
    for t in range(T):
        gates = x[:, t, :] @ params["w_ih"].T + h @ params["w_hh"].T + b
        i = jax.nn.sigmoid(gates[:, 0 * H:1 * H])
        f = jax.nn.sigmoid(gates[:, 1 * H:2 * H])
        g = jnp.tanh(gates[:, 2 * H:3 * H])
        o = jax.nn.sigmoid(gates[:, 3 * H:4 * H])
        c = f * c + i * g
        h = o * jnp.tanh(c)
    return h @ params["w_fc"].T + params["b_fc"]


def init_params(key, input_dim, num_classes):
    H = HIDDEN
    ks = jax.random.split(key, 6)
    s = 1.0 / jnp.sqrt(H)  # PyTorch default uniform bound
    return {
        "w_ih": jax.random.uniform(ks[0], (4 * H, input_dim), jnp.float32, -s, s),
        "w_hh": jax.random.uniform(ks[1], (4 * H, H), jnp.float32, -s, s),
        "b_ih": jax.random.uniform(ks[2], (4 * H,), jnp.float32, -s, s),
        "b_hh": jax.random.uniform(ks[3], (4 * H,), jnp.float32, -s, s),
        "w_fc": jax.random.uniform(ks[4], (num_classes, H), jnp.float32, -s, s),
        "b_fc": jax.random.uniform(ks[5], (num_classes,), jnp.float32, -s, s),
    }


if __name__ == "__main__":
    key = jax.random.PRNGKey(0)
    kx, kp = jax.random.split(key)

    D, C = 16, 10
    params = init_params(kp, D, C)
    prepared = prepare_params(params)        # one-time weight packing

    # (1) small shape from the module spec (use_embedding=False path): (B, T, D)
    x1 = jax.random.normal(kx, (2, 8, D), jnp.float32)
    out1 = jax.block_until_ready(lstm_model_forward(x1, prepared))
    ref1 = lstm_model_reference(x1, params)
    assert out1.shape == (2, C)
    assert jnp.allclose(out1, ref1, atol=2.5e-2, rtol=2.5e-2), (out1, ref1)

    # (2) exercise the multi-chunk time grid + batch/time padding + step guard
    x2 = jax.random.normal(jax.random.PRNGKey(1), (3, 12, D), jnp.float32)
    out2 = jax.block_until_ready(lstm_model_forward(x2, prepared, t_chunk=5))
    ref2 = lstm_model_reference(x2, params)
    assert jnp.allclose(out2, ref2, atol=2.5e-2, rtol=2.5e-2), (out2, ref2)

    # (3) exercise the in-kernel fori_loop path (chunk longer than the unroll cap)
    x3 = jax.random.normal(jax.random.PRNGKey(2), (2, 40, D), jnp.float32)
    out3 = jax.block_until_ready(lstm_model_forward(x3, prepared))
    ref3 = lstm_model_reference(x3, params)
    # bf16 matmul operands compound slightly over 40 serial steps -> loosened tol
    assert jnp.allclose(out3, ref3, atol=4e-2, rtol=4e-2), (out3, ref3)

    print("KERNEL_OK")
</pallas_src>

<mosaic_0001>
module attributes {stable_mosaic.version = 11 : i64} {
  func.func @lstm_kernel(%arg0: i32, %arg1: memref<64x16xbf16, #tpu.memory_space<vmem>>, %arg2: memref<16x256xbf16, #tpu.memory_space<vmem>>, %arg3: memref<128x256xbf16, #tpu.memory_space<vmem>>, %arg4: memref<1x256xf32, #tpu.memory_space<vmem>>, %arg5: memref<128x10xbf16, #tpu.memory_space<vmem>>, %arg6: memref<1x10xf32, #tpu.memory_space<vmem>>, %arg7: memref<8x10xf32, #tpu.memory_space<vmem>>, %arg8: memref<64x256xf32, #tpu.memory_space<vmem>>, %arg9: memref<8x128xf32, #tpu.memory_space<vmem>>) attributes {dimension_semantics = [#tpu.dimension_semantics<arbitrary>], iteration_bounds = array<i64: 1>, scalar_prefetch = 0 : i64, scratch_operands = 2 : i64, tpu.core_type = #tpu.core_type<tc>, window_params = [{transform_indices = @transform_0, window_bounds = array<i64: 64, 16>}, {pipeline_mode = #tpu.pipeline_mode<synchronous>, transform_indices = @transform_1, window_bounds = array<i64: 16, 256>}, {pipeline_mode = #tpu.pipeline_mode<synchronous>, transform_indices = @transform_2, window_bounds = array<i64: 128, 256>}, {pipeline_mode = #tpu.pipeline_mode<synchronous>, transform_indices = @transform_3, window_bounds = array<i64: 1, 256>}, {pipeline_mode = #tpu.pipeline_mode<synchronous>, transform_indices = @transform_4, window_bounds = array<i64: 128, 10>}, {pipeline_mode = #tpu.pipeline_mode<synchronous>, transform_indices = @transform_5, window_bounds = array<i64: 1, 10>}, {pipeline_mode = #tpu.pipeline_mode<synchronous>, transform_indices = @transform_6, window_bounds = array<i64: 8, 10>}]} {
    %c0_i32 = arith.constant 0 : i32
    %0 = arith.cmpi eq, %arg0, %c0_i32 : i32
    %1 = arith.extui %0 : i1 to i32
    %c0_i32_0 = arith.constant 0 : i32
    %2 = arith.cmpi ne, %1, %c0_i32_0 : i32
    scf.if %2 {
      %cst_97 = arith.constant 0.000000e+00 : f32
      %259 = vector.broadcast %cst_97 : f32 to vector<8x128xf32>
      %c0_98 = arith.constant 0 : index
      %c0_99 = arith.constant 0 : index
      %260 = vector.load %arg9[%c0_98, %c0_99] : memref<8x128xf32, #tpu.memory_space<vmem>>, vector<8x128xf32>
      tpu.vector_store %arg9[%c0_98, %c0_99], %259 {strides = array<i32>} : memref<8x128xf32, #tpu.memory_space<vmem>>, vector<8x128xf32>,
    } else {
    }
    %c0 = arith.constant 0 : index
    %c0_1 = arith.constant 0 : index
    %3 = vector.load %arg1[%c0, %c0_1] : memref<64x16xbf16, #tpu.memory_space<vmem>>, vector<64x16xbf16>
    %c0_2 = arith.constant 0 : index
    %c0_3 = arith.constant 0 : index
    %4 = vector.load %arg2[%c0_2, %c0_3] : memref<16x256xbf16, #tpu.memory_space<vmem>>, vector<16x256xbf16>
    %cst = arith.constant dense<0.000000e+00> : vector<64x256xf32>
    %5 = tpu.matmul %3, %4, %cst {dimension_numbers = #tpu.dot_dimension_numbers<[1], [0], [0], [1], [0, 0, 1, 1], [], []>} : vector<64x16xbf16>, vector<16x256xbf16>, vector<64x256xf32> -> vector<64x256xf32>
    %c0_4 = arith.constant 0 : index
    %c0_5 = arith.constant 0 : index
    %6 = vector.load %arg4[%c0_4, %c0_5] : memref<1x256xf32, #tpu.memory_space<vmem>>, vector<1x256xf32>
    %7 = vector.broadcast %6 : vector<1x256xf32> to vector<64x256xf32>
    %8 = arith.addf %5, %7 : vector<64x256xf32>
    %c0_6 = arith.constant 0 : index
    %c0_7 = arith.constant 0 : index
    %9 = vector.load %arg8[%c0_6, %c0_7] : memref<64x256xf32, #tpu.memory_space<vmem>>, vector<64x256xf32>
    tpu.vector_store %arg8[%c0_6, %c0_7], %8 {strides = array<i32>} : memref<64x256xf32, #tpu.memory_space<vmem>>, vector<64x256xf32>,
    %c0_8 = arith.constant 0 : index
    %c0_9 = arith.constant 0 : index
    %10 = vector.load %arg3[%c0_8, %c0_9] : memref<128x256xbf16, #tpu.memory_space<vmem>>, vector<128x256xbf16>
    %11 = tpu.iota {dimensions = array<i32: 1>} : vector<8x128xi32>
    %c64_i32 = arith.constant 64 : i32
    %12 = vector.broadcast %c64_i32 : i32 to vector<8x128xi32>
    %13 = arith.cmpi slt, %11, %12 : vector<8x128xi32>
    %c0_10 = arith.constant 0 : index
    %c0_11 = arith.constant 0 : index
    %14 = vector.load %arg9[%c0_10, %c0_11] : memref<8x128xf32, #tpu.memory_space<vmem>>, vector<8x128xf32>
    %c0_12 = arith.constant 0 : index
    %c0_13 = arith.constant 0 : index
    %15 = vector.load %arg8[%c0_12, %c0_13] : memref<64x256xf32, #tpu.memory_space<vmem>>, vector<8x256xf32>
    %16 = arith.truncf %14 : vector<8x128xf32> to vector<8x128xbf16>
    %cst_14 = arith.constant dense<0.000000e+00> : vector<8x256xf32>
    %17 = tpu.matmul %16, %10, %cst_14 {dimension_numbers = #tpu.dot_dimension_numbers<[1], [0], [0], [1], [0, 0, 1, 1], [], []>} : vector<8x128xbf16>, vector<128x256xbf16>, vector<8x256xf32> -> vector<8x256xf32>
    %18 = arith.addf %15, %17 : vector<8x256xf32>
    %19 = vector.extract_strided_slice %18 {offsets = [0, 0], sizes = [8, 128], strides = [1, 1]} : vector<8x256xf32> to vector<8x128xf32>
    %20 = vector.extract_strided_slice %18 {offsets = [0, 128], sizes = [8, 128], strides = [1, 1]} : vector<8x256xf32> to vector<8x128xf32>
    %cst_15 = arith.constant 5.000000e-01 : f32
    %21 = vector.broadcast %cst_15 : f32 to vector<8x128xf32>
    %22 = arith.mulf %21, %19 : vector<8x128xf32>
    %23 = math.tanh %22 : vector<8x128xf32>
    %cst_16 = arith.constant 5.000000e-01 : f32
    %24 = vector.broadcast %cst_16 : f32 to vector<8x128xf32>
    %25 = arith.mulf %24, %23 : vector<8x128xf32>
    %cst_17 = arith.constant 5.000000e-01 : f32
    %26 = vector.broadcast %cst_17 : f32 to vector<8x128xf32>
    %27 = arith.addf %25, %26 : vector<8x128xf32>
    %cst_18 = arith.constant 5.000000e-01 : f32
    %28 = vector.broadcast %cst_18 : f32 to vector<8x128xf32>
    %29 = arith.mulf %28, %20 : vector<8x128xf32>
    %30 = arith.select %13, %20, %29 : vector<8x128xi1>, vector<8x128xf32>
    %31 = math.tanh %30 : vector<8x128xf32>
    %cst_19 = arith.constant 5.000000e-01 : f32
    %32 = vector.broadcast %cst_19 : f32 to vector<8x128xf32>
    %33 = arith.mulf %32, %31 : vector<8x128xf32>
    %cst_20 = arith.constant 5.000000e-01 : f32
    %34 = vector.broadcast %cst_20 : f32 to vector<8x128xf32>
    %35 = arith.addf %33, %34 : vector<8x128xf32>
    %36 = arith.select %13, %31, %35 : vector<8x128xi1>, vector<8x128xf32>
    %37 = arith.mulf %27, %14 : vector<8x128xf32>
    %38 = arith.mulf %27, %36 : vector<8x128xf32>
    %c64_i32_21 = arith.constant 64 : i32
    %39 = tpu.dynamic_rotate %38 by %c64_i32_21 dim 1 : vector<8x128xf32>, i32 -> vector<8x128xf32>
    %40 = arith.addf %37, %39 : vector<8x128xf32>
    %41 = math.tanh %40 : vector<8x128xf32>
    %42 = arith.mulf %36, %41 : vector<8x128xf32>
    %c64_i32_22 = arith.constant 64 : i32
    %43 = tpu.dynamic_rotate %42 by %c64_i32_22 dim 1 : vector<8x128xf32>, i32 -> vector<8x128xf32>
    %44 = arith.select %13, %43, %40 : vector<8x128xi1>, vector<8x128xf32>
    %c8 = arith.constant 8 : index
    %c0_23 = arith.constant 0 : index
    %45 = vector.load %arg8[%c8, %c0_23] : memref<64x256xf32, #tpu.memory_space<vmem>>, vector<8x256xf32>
    %46 = arith.truncf %44 : vector<8x128xf32> to vector<8x128xbf16>
    %cst_24 = arith.constant dense<0.000000e+00> : vector<8x256xf32>
    %47 = tpu.matmul %46, %10, %cst_24 {dimension_numbers = #tpu.dot_dimension_numbers<[1], [0], [0], [1], [0, 0, 1, 1], [], []>} : vector<8x128xbf16>, vector<128x256xbf16>, vector<8x256xf32> -> vector<8x256xf32>
    %48 = arith.addf %45, %47 : vector<8x256xf32>
    %49 = vector.extract_strided_slice %48 {offsets = [0, 0], sizes = [8, 128], strides = [1, 1]} : vector<8x256xf32> to vector<8x128xf32>
    %50 = vector.extract_strided_slice %48 {offsets = [0, 128], sizes = [8, 128], strides = [1, 1]} : vector<8x256xf32> to vector<8x128xf32>
    %cst_25 = arith.constant 5.000000e-01 : f32
    %51 = vector.broadcast %cst_25 : f32 to vector<8x128xf32>
    %52 = arith.mulf %51, %49 : vector<8x128xf32>
    %53 = math.tanh %52 : vector<8x128xf32>
    %cst_26 = arith.constant 5.000000e-01 : f32
    %54 = vector.broadcast %cst_26 : f32 to vector<8x128xf32>
    %55 = arith.mulf %54, %53 : vector<8x128xf32>
    %cst_27 = arith.constant 5.000000e-01 : f32
    %56 = vector.broadcast %cst_27 : f32 to vector<8x128xf32>
    %57 = arith.addf %55, %56 : vector<8x128xf32>
    %cst_28 = arith.constant 5.000000e-01 : f32
    %58 = vector.broadcast %cst_28 : f32 to vector<8x128xf32>
    %59 = arith.mulf %58, %50 : vector<8x128xf32>
    %60 = arith.select %13, %50, %59 : vector<8x128xi1>, vector<8x128xf32>
    %61 = math.tanh %60 : vector<8x128xf32>
    %cst_29 = arith.constant 5.000000e-01 : f32
    %62 = vector.broadcast %cst_29 : f32 to vector<8x128xf32>
    %63 = arith.mulf %62, %61 : vector<8x128xf32>
    %cst_30 = arith.constant 5.000000e-01 : f32
    %64 = vector.broadcast %cst_30 : f32 to vector<8x128xf32>
    %65 = arith.addf %63, %64 : vector<8x128xf32>
    %66 = arith.select %13, %61, %65 : vector<8x128xi1>, vector<8x128xf32>
    %67 = arith.mulf %57, %44 : vector<8x128xf32>
    %68 = arith.mulf %57, %66 : vector<8x128xf32>
    %c64_i32_31 = arith.constant 64 : i32
    %69 = tpu.dynamic_rotate %68 by %c64_i32_31 dim 1 : vector<8x128xf32>, i32 -> vector<8x128xf32>
    %70 = arith.addf %67, %69 : vector<8x128xf32>
    %71 = math.tanh %70 : vector<8x128xf32>
    %72 = arith.mulf %66, %71 : vector<8x128xf32>
    %c64_i32_32 = arith.constant 64 : i32
    %73 = tpu.dynamic_rotate %72 by %c64_i32_32 dim 1 : vector<8x128xf32>, i32 -> vector<8x128xf32>
    %74 = arith.select %13, %73, %70 : vector<8x128xi1>, vector<8x128xf32>
    %c16 = arith.constant 16 : index
    %c0_33 = arith.constant 0 : index
    %75 = vector.load %arg8[%c16, %c0_33] : memref<64x256xf32, #tpu.memory_space<vmem>>, vector<8x256xf32>
    %76 = arith.truncf %74 : vector<8x128xf32> to vector<8x128xbf16>
    %cst_34 = arith.constant dense<0.000000e+00> : vector<8x256xf32>
    %77 = tpu.matmul %76, %10, %cst_34 {dimension_numbers = #tpu.dot_dimension_numbers<[1], [0], [0], [1], [0, 0, 1, 1], [], []>} : vector<8x128xbf16>, vector<128x256xbf16>, vector<8x256xf32> -> vector<8x256xf32>
    %78 = arith.addf %75, %77 : vector<8x256xf32>
    %79 = vector.extract_strided_slice %78 {offsets = [0, 0], sizes = [8, 128], strides = [1, 1]} : vector<8x256xf32> to vector<8x128xf32>
    %80 = vector.extract_strided_slice %78 {offsets = [0, 128], sizes = [8, 128], strides = [1, 1]} : vector<8x256xf32> to vector<8x128xf32>
    %cst_35 = arith.constant 5.000000e-01 : f32
    %81 = vector.broadcast %cst_35 : f32 to vector<8x128xf32>
    %82 = arith.mulf %81, %79 : vector<8x128xf32>
    %83 = math.tanh %82 : vector<8x128xf32>
    %cst_36 = arith.constant 5.000000e-01 : f32
    %84 = vector.broadcast %cst_36 : f32 to vector<8x128xf32>
    %85 = arith.mulf %84, %83 : vector<8x128xf32>
    %cst_37 = arith.constant 5.000000e-01 : f32
    %86 = vector.broadcast %cst_37 : f32 to vector<8x128xf32>
    %87 = arith.addf %85, %86 : vector<8x128xf32>
    %cst_38 = arith.constant 5.000000e-01 : f32
    %88 = vector.broadcast %cst_38 : f32 to vector<8x128xf32>
    %89 = arith.mulf %88, %80 : vector<8x128xf32>
    %90 = arith.select %13, %80, %89 : vector<8x128xi1>, vector<8x128xf32>
    %91 = math.tanh %90 : vector<8x128xf32>
    %cst_39 = arith.constant 5.000000e-01 : f32
    %92 = vector.broadcast %cst_39 : f32 to vector<8x128xf32>
    %93 = arith.mulf %92, %91 : vector<8x128xf32>
    %cst_40 = arith.constant 5.000000e-01 : f32
    %94 = vector.broadcast %cst_40 : f32 to vector<8x128xf32>
    %95 = arith.addf %93, %94 : vector<8x128xf32>
    %96 = arith.select %13, %91, %95 : vector<8x128xi1>, vector<8x128xf32>
    %97 = arith.mulf %87, %74 : vector<8x128xf32>
    %98 = arith.mulf %87, %96 : vector<8x128xf32>
    %c64_i32_41 = arith.constant 64 : i32
    %99 = tpu.dynamic_rotate %98 by %c64_i32_41 dim 1 : vector<8x128xf32>, i32 -> vector<8x128xf32>
    %100 = arith.addf %97, %99 : vector<8x128xf32>
    %101 = math.tanh %100 : vector<8x128xf32>
    %102 = arith.mulf %96, %101 : vector<8x128xf32>
    %c64_i32_42 = arith.constant 64 : i32
    %103 = tpu.dynamic_rotate %102 by %c64_i32_42 dim 1 : vector<8x128xf32>, i32 -> vector<8x128xf32>
    %104 = arith.select %13, %103, %100 : vector<8x128xi1>, vector<8x128xf32>
    %c24 = arith.constant 24 : index
    %c0_43 = arith.constant 0 : index
    %105 = vector.load %arg8[%c24, %c0_43] : memref<64x256xf32, #tpu.memory_space<vmem>>, vector<8x256xf32>
    %106 = arith.truncf %104 : vector<8x128xf32> to vector<8x128xbf16>
    %cst_44 = arith.constant dense<0.000000e+00> : vector<8x256xf32>
    %107 = tpu.matmul %106, %10, %cst_44 {dimension_numbers = #tpu.dot_dimension_numbers<[1], [0], [0], [1], [0, 0, 1, 1], [], []>} : vector<8x128xbf16>, vector<128x256xbf16>, vector<8x256xf32> -> vector<8x256xf32>
    %108 = arith.addf %105, %107 : vector<8x256xf32>
    %109 = vector.extract_strided_slice %108 {offsets = [0, 0], sizes = [8, 128], strides = [1, 1]} : vector<8x256xf32> to vector<8x128xf32>
    %110 = vector.extract_strided_slice %108 {offsets = [0, 128], sizes = [8, 128], strides = [1, 1]} : vector<8x256xf32> to vector<8x128xf32>
    %cst_45 = arith.constant 5.000000e-01 : f32
    %111 = vector.broadcast %cst_45 : f32 to vector<8x128xf32>
    %112 = arith.mulf %111, %109 : vector<8x128xf32>
    %113 = math.tanh %112 : vector<8x128xf32>
    %cst_46 = arith.constant 5.000000e-01 : f32
    %114 = vector.broadcast %cst_46 : f32 to vector<8x128xf32>
    %115 = arith.mulf %114, %113 : vector<8x128xf32>
    %cst_47 = arith.constant 5.000000e-01 : f32
    %116 = vector.broadcast %cst_47 : f32 to vector<8x128xf32>
    %117 = arith.addf %115, %116 : vector<8x128xf32>
    %cst_48 = arith.constant 5.000000e-01 : f32
    %118 = vector.broadcast %cst_48 : f32 to vector<8x128xf32>
    %119 = arith.mulf %118, %110 : vector<8x128xf32>
    %120 = arith.select %13, %110, %119 : vector<8x128xi1>, vector<8x128xf32>
    %121 = math.tanh %120 : vector<8x128xf32>
    %cst_49 = arith.constant 5.000000e-01 : f32
    %122 = vector.broadcast %cst_49 : f32 to vector<8x128xf32>
    %123 = arith.mulf %122, %121 : vector<8x128xf32>
    %cst_50 = arith.constant 5.000000e-01 : f32
    %124 = vector.broadcast %cst_50 : f32 to vector<8x128xf32>
    %125 = arith.addf %123, %124 : vector<8x128xf32>
    %126 = arith.select %13, %121, %125 : vector<8x128xi1>, vector<8x128xf32>
    %127 = arith.mulf %117, %104 : vector<8x128xf32>
    %128 = arith.mulf %117, %126 : vector<8x128xf32>
    %c64_i32_51 = arith.constant 64 : i32
    %129 = tpu.dynamic_rotate %128 by %c64_i32_51 dim 1 : vector<8x128xf32>, i32 -> vector<8x128xf32>
    %130 = arith.addf %127, %129 : vector<8x128xf32>
    %131 = math.tanh %130 : vector<8x128xf32>
    %132 = arith.mulf %126, %131 : vector<8x128xf32>
    %c64_i32_52 = arith.constant 64 : i32
    %133 = tpu.dynamic_rotate %132 by %c64_i32_52 dim 1 : vector<8x128xf32>, i32 -> vector<8x128xf32>
    %134 = arith.select %13, %133, %130 : vector<8x128xi1>, vector<8x128xf32>
    %c32 = arith.constant 32 : index
    %c0_53 = arith.constant 0 : index
    %135 = vector.load %arg8[%c32, %c0_53] : memref<64x256xf32, #tpu.memory_space<vmem>>, vector<8x256xf32>
    %136 = arith.truncf %134 : vector<8x128xf32> to vector<8x128xbf16>
    %cst_54 = arith.constant dense<0.000000e+00> : vector<8x256xf32>
    %137 = tpu.matmul %136, %10, %cst_54 {dimension_numbers = #tpu.dot_dimension_numbers<[1], [0], [0], [1], [0, 0, 1, 1], [], []>} : vector<8x128xbf16>, vector<128x256xbf16>, vector<8x256xf32> -> vector<8x256xf32>
    %138 = arith.addf %135, %137 : vector<8x256xf32>
    %139 = vector.extract_strided_slice %138 {offsets = [0, 0], sizes = [8, 128], strides = [1, 1]} : vector<8x256xf32> to vector<8x128xf32>
    %140 = vector.extract_strided_slice %138 {offsets = [0, 128], sizes = [8, 128], strides = [1, 1]} : vector<8x256xf32> to vector<8x128xf32>
    %cst_55 = arith.constant 5.000000e-01 : f32
    %141 = vector.broadcast %cst_55 : f32 to vector<8x128xf32>
    %142 = arith.mulf %141, %139 : vector<8x128xf32>
    %143 = math.tanh %142 : vector<8x128xf32>
    %cst_56 = arith.constant 5.000000e-01 : f32
    %144 = vector.broadcast %cst_56 : f32 to vector<8x128xf32>
    %145 = arith.mulf %144, %143 : vector<8x128xf32>
    %cst_57 = arith.constant 5.000000e-01 : f32
    %146 = vector.broadcast %cst_57 : f32 to vector<8x128xf32>
    %147 = arith.addf %145, %146 : vector<8x128xf32>
    %cst_58 = arith.constant 5.000000e-01 : f32
    %148 = vector.broadcast %cst_58 : f32 to vector<8x128xf32>
    %149 = arith.mulf %148, %140 : vector<8x128xf32>
    %150 = arith.select %13, %140, %149 : vector<8x128xi1>, vector<8x128xf32>
    %151 = math.tanh %150 : vector<8x128xf32>
    %cst_59 = arith.constant 5.000000e-01 : f32
    %152 = vector.broadcast %cst_59 : f32 to vector<8x128xf32>
    %153 = arith.mulf %152, %151 : vector<8x128xf32>
    %cst_60 = arith.constant 5.000000e-01 : f32
    %154 = vector.broadcast %cst_60 : f32 to vector<8x128xf32>
    %155 = arith.addf %153, %154 : vector<8x128xf32>
    %156 = arith.select %13, %151, %155 : vector<8x128xi1>, vector<8x128xf32>
    %157 = arith.mulf %147, %134 : vector<8x128xf32>
    %158 = arith.mulf %147, %156 : vector<8x128xf32>
    %c64_i32_61 = arith.constant 64 : i32
    %159 = tpu.dynamic_rotate %158 by %c64_i32_61 dim 1 : vector<8x128xf32>, i32 -> vector<8x128xf32>
    %160 = arith.addf %157, %159 : vector<8x128xf32>
    %161 = math.tanh %160 : vector<8x128xf32>
    %162 = arith.mulf %156, %161 : vector<8x128xf32>
    %c64_i32_62 = arith.constant 64 : i32
    %163 = tpu.dynamic_rotate %162 by %c64_i32_62 dim 1 : vector<8x128xf32>, i32 -> vector<8x128xf32>
    %164 = arith.select %13, %163, %160 : vector<8x128xi1>, vector<8x128xf32>
    %c40 = arith.constant 40 : index
    %c0_63 = arith.constant 0 : index
    %165 = vector.load %arg8[%c40, %c0_63] : memref<64x256xf32, #tpu.memory_space<vmem>>, vector<8x256xf32>
    %166 = arith.truncf %164 : vector<8x128xf32> to vector<8x128xbf16>
    %cst_64 = arith.constant dense<0.000000e+00> : vector<8x256xf32>
    %167 = tpu.matmul %166, %10, %cst_64 {dimension_numbers = #tpu.dot_dimension_numbers<[1], [0], [0], [1], [0, 0, 1, 1], [], []>} : vector<8x128xbf16>, vector<128x256xbf16>, vector<8x256xf32> -> vector<8x256xf32>
    %168 = arith.addf %165, %167 : vector<8x256xf32>
    %169 = vector.extract_strided_slice %168 {offsets = [0, 0], sizes = [8, 128], strides = [1, 1]} : vector<8x256xf32> to vector<8x128xf32>
    %170 = vector.extract_strided_slice %168 {offsets = [0, 128], sizes = [8, 128], strides = [1, 1]} : vector<8x256xf32> to vector<8x128xf32>
    %cst_65 = arith.constant 5.000000e-01 : f32
    %171 = vector.broadcast %cst_65 : f32 to vector<8x128xf32>
    %172 = arith.mulf %171, %169 : vector<8x128xf32>
    %173 = math.tanh %172 : vector<8x128xf32>
    %cst_66 = arith.constant 5.000000e-01 : f32
    %174 = vector.broadcast %cst_66 : f32 to vector<8x128xf32>
    %175 = arith.mulf %174, %173 : vector<8x128xf32>
    %cst_67 = arith.constant 5.000000e-01 : f32
    %176 = vector.broadcast %cst_67 : f32 to vector<8x128xf32>
    %177 = arith.addf %175, %176 : vector<8x128xf32>
    %cst_68 = arith.constant 5.000000e-01 : f32
    %178 = vector.broadcast %cst_68 : f32 to vector<8x128xf32>
    %179 = arith.mulf %178, %170 : vector<8x128xf32>
    %180 = arith.select %13, %170, %179 : vector<8x128xi1>, vector<8x128xf32>
    %181 = math.tanh %180 : vector<8x128xf32>
    %cst_69 = arith.constant 5.000000e-01 : f32
    %182 = vector.broadcast %cst_69 : f32 to vector<8x128xf32>
    %183 = arith.mulf %182, %181 : vector<8x128xf32>
    %cst_70 = arith.constant 5.000000e-01 : f32
    %184 = vector.broadcast %cst_70 : f32 to vector<8x128xf32>
    %185 = arith.addf %183, %184 : vector<8x128xf32>
    %186 = arith.select %13, %181, %185 : vector<8x128xi1>, vector<8x128xf32>
    %187 = arith.mulf %177, %164 : vector<8x128xf32>
    %188 = arith.mulf %177, %186 : vector<8x128xf32>
    %c64_i32_71 = arith.constant 64 : i32
    %189 = tpu.dynamic_rotate %188 by %c64_i32_71 dim 1 : vector<8x128xf32>, i32 -> vector<8x128xf32>
    %190 = arith.addf %187, %189 : vector<8x128xf32>
    %191 = math.tanh %190 : vector<8x128xf32>
    %192 = arith.mulf %186, %191 : vector<8x128xf32>
    %c64_i32_72 = arith.constant 64 : i32
    %193 = tpu.dynamic_rotate %192 by %c64_i32_72 dim 1 : vector<8x128xf32>, i32 -> vector<8x128xf32>
    %194 = arith.select %13, %193, %190 : vector<8x128xi1>, vector<8x128xf32>
    %c48 = arith.constant 48 : index
    %c0_73 = arith.constant 0 : index
    %195 = vector.load %arg8[%c48, %c0_73] : memref<64x256xf32, #tpu.memory_space<vmem>>, vector<8x256xf32>
    %196 = arith.truncf %194 : vector<8x128xf32> to vector<8x128xbf16>
    %cst_74 = arith.constant dense<0.000000e+00> : vector<8x256xf32>
    %197 = tpu.matmul %196, %10, %cst_74 {dimension_numbers = #tpu.dot_dimension_numbers<[1], [0], [0], [1], [0, 0, 1, 1], [], []>} : vector<8x128xbf16>, vector<128x256xbf16>, vector<8x256xf32> -> vector<8x256xf32>
    %198 = arith.addf %195, %197 : vector<8x256xf32>
    %199 = vector.extract_strided_slice %198 {offsets = [0, 0], sizes = [8, 128], strides = [1, 1]} : vector<8x256xf32> to vector<8x128xf32>
    %200 = vector.extract_strided_slice %198 {offsets = [0, 128], sizes = [8, 128], strides = [1, 1]} : vector<8x256xf32> to vector<8x128xf32>
    %cst_75 = arith.constant 5.000000e-01 : f32
    %201 = vector.broadcast %cst_75 : f32 to vector<8x128xf32>
    %202 = arith.mulf %201, %199 : vector<8x128xf32>
    %203 = math.tanh %202 : vector<8x128xf32>
    %cst_76 = arith.constant 5.000000e-01 : f32
    %204 = vector.broadcast %cst_76 : f32 to vector<8x128xf32>
    %205 = arith.mulf %204, %203 : vector<8x128xf32>
    %cst_77 = arith.constant 5.000000e-01 : f32
    %206 = vector.broadcast %cst_77 : f32 to vector<8x128xf32>
    %207 = arith.addf %205, %206 : vector<8x128xf32>
    %cst_78 = arith.constant 5.000000e-01 : f32
    %208 = vector.broadcast %cst_78 : f32 to vector<8x128xf32>
    %209 = arith.mulf %208, %200 : vector<8x128xf32>
    %210 = arith.select %13, %200, %209 : vector<8x128xi1>, vector<8x128xf32>
    %211 = math.tanh %210 : vector<8x128xf32>
    %cst_79 = arith.constant 5.000000e-01 : f32
    %212 = vector.broadcast %cst_79 : f32 to vector<8x128xf32>
    %213 = arith.mulf %212, %211 : vector<8x128xf32>
    %cst_80 = arith.constant 5.000000e-01 : f32
    %214 = vector.broadcast %cst_80 : f32 to vector<8x128xf32>
    %215 = arith.addf %213, %214 : vector<8x128xf32>
    %216 = arith.select %13, %211, %215 : vector<8x128xi1>, vector<8x128xf32>
    %217 = arith.mulf %207, %194 : vector<8x128xf32>
    %218 = arith.mulf %207, %216 : vector<8x128xf32>
    %c64_i32_81 = arith.constant 64 : i32
    %219 = tpu.dynamic_rotate %218 by %c64_i32_81 dim 1 : vector<8x128xf32>, i32 -> vector<8x128xf32>
    %220 = arith.addf %217, %219 : vector<8x128xf32>
    %221 = math.tanh %220 : vector<8x128xf32>
    %222 = arith.mulf %216, %221 : vector<8x128xf32>
    %c64_i32_82 = arith.constant 64 : i32
    %223 = tpu.dynamic_rotate %222 by %c64_i32_82 dim 1 : vector<8x128xf32>, i32 -> vector<8x128xf32>
    %224 = arith.select %13, %223, %220 : vector<8x128xi1>, vector<8x128xf32>
    %c56 = arith.constant 56 : index
    %c0_83 = arith.constant 0 : index
    %225 = vector.load %arg8[%c56, %c0_83] : memref<64x256xf32, #tpu.memory_space<vmem>>, vector<8x256xf32>
    %226 = arith.truncf %224 : vector<8x128xf32> to vector<8x128xbf16>
    %cst_84 = arith.constant dense<0.000000e+00> : vector<8x256xf32>
    %227 = tpu.matmul %226, %10, %cst_84 {dimension_numbers = #tpu.dot_dimension_numbers<[1], [0], [0], [1], [0, 0, 1, 1], [], []>} : vector<8x128xbf16>, vector<128x256xbf16>, vector<8x256xf32> -> vector<8x256xf32>
    %228 = arith.addf %225, %227 : vector<8x256xf32>
    %229 = vector.extract_strided_slice %228 {offsets = [0, 0], sizes = [8, 128], strides = [1, 1]} : vector<8x256xf32> to vector<8x128xf32>
    %230 = vector.extract_strided_slice %228 {offsets = [0, 128], sizes = [8, 128], strides = [1, 1]} : vector<8x256xf32> to vector<8x128xf32>
    %cst_85 = arith.constant 5.000000e-01 : f32
    %231 = vector.broadcast %cst_85 : f32 to vector<8x128xf32>
    %232 = arith.mulf %231, %229 : vector<8x128xf32>
    %233 = math.tanh %232 : vector<8x128xf32>
    %cst_86 = arith.constant 5.000000e-01 : f32
    %234 = vector.broadcast %cst_86 : f32 to vector<8x128xf32>
    %235 = arith.mulf %234, %233 : vector<8x128xf32>
    %cst_87 = arith.constant 5.000000e-01 : f32
    %236 = vector.broadcast %cst_87 : f32 to vector<8x128xf32>
    %237 = arith.addf %235, %236 : vector<8x128xf32>
    %cst_88 = arith.constant 5.000000e-01 : f32
    %238 = vector.broadcast %cst_88 : f32 to vector<8x128xf32>
    %239 = arith.mulf %238, %230 : vector<8x128xf32>
    %240 = arith.select %13, %230, %239 : vector<8x128xi1>, vector<8x128xf32>
    %241 = math.tanh %240 : vector<8x128xf32>
    %cst_89 = arith.constant 5.000000e-01 : f32
    %242 = vector.broadcast %cst_89 : f32 to vector<8x128xf32>
    %243 = arith.mulf %242, %241 : vector<8x128xf32>
    %cst_90 = arith.constant 5.000000e-01 : f32
    %244 = vector.broadcast %cst_90 : f32 to vector<8x128xf32>
    %245 = arith.addf %243, %244 : vector<8x128xf32>
    %246 = arith.select %13, %241, %245 : vector<8x128xi1>, vector<8x128xf32>
    %247 = arith.mulf %237, %224 : vector<8x128xf32>
    %248 = arith.mulf %237, %246 : vector<8x128xf32>
    %c64_i32_91 = arith.constant 64 : i32
    %249 = tpu.dynamic_rotate %248 by %c64_i32_91 dim 1 : vector<8x128xf32>, i32 -> vector<8x128xf32>
    %250 = arith.addf %247, %249 : vector<8x128xf32>
    %251 = math.tanh %250 : vector<8x128xf32>
    %252 = arith.mulf %246, %251 : vector<8x128xf32>
    %c64_i32_92 = arith.constant 64 : i32
    %253 = tpu.dynamic_rotate %252 by %c64_i32_92 dim 1 : vector<8x128xf32>, i32 -> vector<8x128xf32>
    %254 = arith.select %13, %253, %250 : vector<8x128xi1>, vector<8x128xf32>
    %c0_93 = arith.constant 0 : index
    %c0_94 = arith.constant 0 : index
    %255 = vector.load %arg9[%c0_93, %c0_94] : memref<8x128xf32, #tpu.memory_space<vmem>>, vector<8x128xf32>
    tpu.vector_store %arg9[%c0_93, %c0_94], %254 {strides = array<i32>} : memref<8x128xf32, #tpu.memory_space<vmem>>, vector<8x128xf32>,
    %c0_i32_95 = arith.constant 0 : i32
    %256 = arith.cmpi eq, %arg0, %c0_i32_95 : i32
    %257 = arith.extui %256 : i1 to i32
    %c0_i32_96 = arith.constant 0 : i32
    %258 = arith.cmpi ne, %257, %c0_i32_96 : i32
    scf.if %258 {
      %c0_97 = arith.constant 0 : index
      %c0_98 = arith.constant 0 : index
      %259 = vector.load %arg9[%c0_97, %c0_98] : memref<8x128xf32, #tpu.memory_space<vmem>>, vector<8x128xf32>
      %260 = arith.truncf %259 : vector<8x128xf32> to vector<8x128xbf16>
      %c0_99 = arith.constant 0 : index
      %c0_100 = arith.constant 0 : index
      %261 = vector.load %arg5[%c0_99, %c0_100] : memref<128x10xbf16, #tpu.memory_space<vmem>>, vector<128x10xbf16>
      %cst_101 = arith.constant dense<0.000000e+00> : vector<8x10xf32>
      %262 = tpu.matmul %260, %261, %cst_101 {dimension_numbers = #tpu.dot_dimension_numbers<[1], [0], [0], [1], [0, 0, 1, 1], [], []>} : vector<8x128xbf16>, vector<128x10xbf16>, vector<8x10xf32> -> vector<8x10xf32>
      %c0_102 = arith.constant 0 : index
      %c0_103 = arith.constant 0 : index
      %263 = vector.load %arg6[%c0_102, %c0_103] : memref<1x10xf32, #tpu.memory_space<vmem>>, vector<1x10xf32>
      %264 = vector.broadcast %263 : vector<1x10xf32> to vector<8x10xf32>
      %265 = arith.addf %262, %264 : vector<8x10xf32>
      %c0_104 = arith.constant 0 : index
      %c0_105 = arith.constant 0 : index
      %266 = vector.load %arg7[%c0_104, %c0_105] : memref<8x10xf32, #tpu.memory_space<vmem>>, vector<8x10xf32>
      tpu.vector_store %arg7[%c0_104, %c0_105], %265 {strides = array<i32>} : memref<8x10xf32, #tpu.memory_space<vmem>>, vector<8x10xf32>,
    } else {
    }
    return
  }
  func.func @transform_0(%arg0: i32) -> (i32, i32) {
    %c0_i32 = arith.constant 0 : i32
    %c0_i32_0 = arith.constant 0 : i32
    return %arg0, %c0_i32 : i32, i32
  }
  func.func @transform_1(%arg0: i32) -> (i32, i32) {
    %c0_i32 = arith.constant 0 : i32
    %c0_i32_0 = arith.constant 0 : i32
    %c0_i32_1 = arith.constant 0 : i32
    return %c0_i32, %c0_i32_0 : i32, i32
  }
  func.func @transform_2(%arg0: i32) -> (i32, i32) {
    %c0_i32 = arith.constant 0 : i32
    %c0_i32_0 = arith.constant 0 : i32
    %c0_i32_1 = arith.constant 0 : i32
    return %c0_i32, %c0_i32_0 : i32, i32
  }
  func.func @transform_3(%arg0: i32) -> (i32, i32) {
    %c0_i32 = arith.constant 0 : i32
    %c0_i32_0 = arith.constant 0 : i32
    %c0_i32_1 = arith.constant 0 : i32
    return %c0_i32, %c0_i32_0 : i32, i32
  }
  func.func @transform_4(%arg0: i32) -> (i32, i32) {
    %c0_i32 = arith.constant 0 : i32
    %c0_i32_0 = arith.constant 0 : i32
    %c0_i32_1 = arith.constant 0 : i32
    return %c0_i32, %c0_i32_0 : i32, i32
  }
  func.func @transform_5(%arg0: i32) -> (i32, i32) {
    %c0_i32 = arith.constant 0 : i32
    %c0_i32_0 = arith.constant 0 : i32
    %c0_i32_1 = arith.constant 0 : i32
    return %c0_i32, %c0_i32_0 : i32, i32
  }
  func.func @transform_6(%arg0: i32) -> (i32, i32) {
    %c0_i32 = arith.constant 0 : i32
    %c0_i32_0 = arith.constant 0 : i32
    %c0_i32_1 = arith.constant 0 : i32
    return %c0_i32, %c0_i32_0 : i32, i32
  }
}

</mosaic_0001>

<bundles_post_ra>
// kernel: tpu_custom_call.1
= control target key start
LH: loop header
LB: loop body
LE: loop exit
PB: predicated region body
PF: predicated region fallthrough
CT: control target
= control target key end

     0   :  { %11 = vsyncpa [#allocation5], 0  ;;  %s1589_s0 = inlined_call_operand.vmem [shape: bf16[64,16], index: 0, kind: input, shape index: {}]   ;;  %s1590_s1 = inlined_call_operand.vmem [shape: bf16[16,256], index: 1, kind: input, shape index: {}]   ;;  %s1591_s2 = inlined_call_operand.hbm [shape: bf16[128,256], index: 2, kind: input, shape index: {}]   ;;  %s1592_s3 = inlined_call_operand.vmem [shape: f32[1,256], index: 3, kind: input, shape index: {}]   ;;  %s1593_s4 = inlined_call_operand.vmem [shape: bf16[128,10], index: 4, kind: input, shape index: {}]   ;;  %s1594_s5 = inlined_call_operand.vmem [shape: f32[1,10], index: 5, kind: input, shape index: {}]   ;;  %s1595_s6 = inlined_call_operand.hbm [shape: f32[8,10], index: 6, kind: output, shape index: {}]  }
   0x1   :  { %12 = vsyncpa [#allocation6], 0  ;;  %s1168_s21 = smov [#allocation4]   ;;  %s1120_s25 = scalar_lea.hbm %s1591_s2, 2048 }
   0x2   :  { %s22_s22 = sshll.u32 %s1168_s21, 4  ;;  %p1121_p0 = scmp.ne.s32.totalorder %s1591_s2, %s1120_s25  ;;  %s23_s22 = int_to_ptr.vmem [resolvable:$true] %s22_s22 }
   0x3   :  { %p1124_p1 = scmp.lt.u32.totalorder %s1120_s25, %s1591_s2 }
   0x5   :  { %p1126_p2 = pnand %p1124_p1, %p1121_p0 }
   0x7   :  { %1129 = shalt.err (!%p1126_p2)
}
   0x8   :  { %s1130_s30 = scalar_lea.vmem %s23_s22, 2048  ;;  %p1135_p4 = scmp.lt.s32.totalorder %s23_s22, %s23_s22 }
   0x9   :  { %p1131_p3 = scmp.ne.s32.totalorder %s23_s22, %s1130_s30  ;;  %p1136_p5 = scmp.lt.s32.totalorder %s1130_s30, %s1130_s30 }
   0xb   :  { %p1137_p6 = por %p1136_p5, %p1135_p4 }
   0xd   :  { %p1138_p7 = pnand %p1137_p6, %p1131_p3 }
   0xf   :  { %1141 = shalt.err (!%p1138_p7)
}
  0x10   :  { %s1169_s7 = smov 128   ;;  %s1170_s8 = smov 8  }
  0x11   :  { %28 = dma.hbm_to_vmem [thread:$0]  %s1591_s2, 2048, %s23_s22, [#allocation5], %s1169_s7, %s1169_s7, %s1170_s8  }
  0x12   :  { %1164 = dma.done.wait [#allocation5], 2048  }
  0x13   :  { %1165 = vsyncadd [#allocation5], 4294965248  ;;  %v1171_v0 = vmov 0   ;;  %v1226_v1 = vld [vmem:[#allocation4 + $0x4] ss:$8 sps:$4 sm:$0xff]   ;;  %vm96_vm0 = vcmask 130048   ;;  %v56_v22 = vlaneseq }
  0x14   :  { %141 = vmatprep.mubr.bf16.mxu0 %v1171_v0  ;;  %333 = vmatprep.mubr.bf16.mxu1 %v1171_v0  ;;  %v1228_v2 = vld [vmem:[#allocation4] ss:$8 sps:$4 sm:$0xff]   ;;  %v1231_v3 = vld [vmem:[#allocation4 + $0x14] ss:$8 sps:$4 sm:$0xff]   ;;  %v1234_v4 = vld [vmem:[#allocation4 + $0x10] ss:$8 sps:$4 sm:$0xff]  }
  0x15   :  { %301 = vmatprep.subr.bf16.mxu1 %v1226_v1  ;;  %v1237_v5 = vld [vmem:[#allocation4 + $0x24] ss:$8 sps:$4 sm:$0xff]   ;;  %v1240_v6 = vld [vmem:[#allocation4 + $0x20] ss:$8 sps:$4 sm:$0xff]   ;;  %v1242_v7 = vld [vmem:[#allocation4 + $0x34] ss:$8 sps:$4 sm:$0xff]  }
  0x16   :  { %302 = vmatpush1.bf16.msra.mxu1 %v1228_v2  ;;  %v1051_v8 = vld [vmem:[%s1590_s1 + $0x4] ss:$8 sps:$4 sm:$0xff]   ;;  %v1053_v9 = vld [vmem:[%s1590_s1] ss:$8 sps:$4 sm:$0xff]   ;;  %v1251_v10 = vld [vmem:[#allocation4 + $0x30] ss:$8 sps:$4 sm:$0xff]  }
  0x17   :  { %303 = vmatprep.subr.bf16.mxu1 %v1231_v3  ;;  %109 = vmatprep.subr.bf16.mxu0 %v1051_v8  ;;  %v1057_v11 = vld [vmem:[%s1589_s0] sm:$0xff]   ;;  %v1263_v14 = vld [vmem:[#allocation4 + $0x54] ss:$8 sps:$4 sm:$0xff]   ;;  %v1270_v15 = vld [vmem:[#allocation4 + $0x50] ss:$8 sps:$4 sm:$0xff]   ;;  %v1172_v20 = vmov 0.0|0.0  }
  0x18   :  { %110 = vmatpush1.bf16.msra.mxu0 %v1053_v9  ;;  %v1258_v12 = vld [vmem:[#allocation4 + $0x44] ss:$8 sps:$4 sm:$0xff]   ;;  %v1261_v13 = vld [vmem:[#allocation4 + $0x40] ss:$8 sps:$4 sm:$0xff]   ;;  %v1284_v18 = vld [vmem:[#allocation4 + $0x74] ss:$8 sps:$4 sm:$0xff]  }
  0x19   :  { %367 = vmatprep.subr.bf16.mxu0 %v1226_v1  ;;  %v1276_v16 = vld [vmem:[#allocation4 + $0x64] ss:$8 sps:$4 sm:$0xff]   ;;  %v1280_v17 = vld [vmem:[#allocation4 + $0x60] ss:$8 sps:$4 sm:$0xff]   ;;  %v1288_v19 = vld [vmem:[#allocation4 + $0x70] ss:$8 sps:$4 sm:$0xff]  }
  0x1a   :  { %304 = vmatpush1.bf16.msra.mxu1 %v1234_v4  ;;  %v57_v26 = vshrl.u32 %v56_v22, 7  ;;  %v54_v28 = vld [vmem:[%s1592_s3] sm:$0x3]  ;;  %v1333_v34 = vand.u32 127, %v56_v22  ;;  %s1173_s3 = smov 64   ;;  %v1061_v52 = vld [vmem:[%s1589_s0 + $0x8] sm:$0xff]  }
  0x1b   :  { %305 = vmatprep.subr.bf16.mxu1 %v1237_v5  ;;  %966 = vmatmul.mubr.msk.bf16.vlgmr.msra.gmra.mrb[0].mxu0 %vm96_vm0, %v1057_v11  ;;  %v1062_v53 = vld [vmem:[%s1589_s0 + $0x10] sm:$0xff]   ;;  %v1063_v54 = vld [vmem:[%s1589_s0 + $0x18] sm:$0xff]   ;;  %vm1175_vm2 = vmmov 0   ;;  %s1176_s15 = smov [#allocation7]   ;;  %vm943_vm3 = vcmask 80896  }
  0x1c   :  { %368 = vmatpush1.bf16.msra.mxu0 %v1228_v2  ;;  %151 = vmatprep.mubr.bf16.mxu0 %v1171_v0  ;;  %v58_v27 = vsub.s32 0, %v57_v26  ;;  %v62_v29 = vsub.s32 1, %v57_v26  ;;  %vm216_vm1 = vcmp.lt.s32.totalorder %v1333_v34, 64 }
  0x1d   :  { %369 = vmatprep.subr.bf16.mxu0 %v1231_v3 }
  0x1e   :  { %306 = vmatpush1.bf16.msra.mxu1 %v1240_v6  ;;  %v1327_v30 = vrot.slane %v54_v28, %v58_v27  ;;  %v1329_v31 = vrot.slane %v54_v28, %v62_v29 }
  0x1f   :  { %307 = vmatprep.subr.bf16.mxu1 %v1242_v7 }
  0x20   :  { %370 = vmatpush1.bf16.msra.mxu0 %v1234_v4 }
  0x21   :  { %371 = vmatprep.subr.bf16.mxu0 %v1237_v5 }
  0x22   :  { %308 = vmatpush1.bf16.msra.mxu1 %v1251_v10 }
  0x23   :  { %309 = vmatprep.subr.bf16.mxu1 %v1258_v12  ;;  %967 = vmatmul.mubr.msk.bf16.gmra.mrb[4].mxu0 %vm96_vm0, %v1061_v52 }
  0x24   :  { %372 = vmatpush1.bf16.msra.mxu0 %v1240_v6  ;;  %161 = vmatprep.mubr.bf16.mxu0 %v1171_v0 }
  0x25   :  { %373 = vmatprep.subr.bf16.mxu0 %v1242_v7 }
  0x26   :  { %310 = vmatpush1.bf16.msra.mxu1 %v1261_v13 }
  0x27   :  { %311 = vmatprep.subr.bf16.mxu1 %v1263_v14 }
  0x28   :  { %374 = vmatpush1.bf16.msra.mxu0 %v1251_v10 }
  0x29   :  { %375 = vmatprep.subr.bf16.mxu0 %v1258_v12 }
  0x2a   :  { %312 = vmatpush1.bf16.msra.mxu1 %v1270_v15 }
  0x2b   :  { %313 = vmatprep.subr.bf16.mxu1 %v1276_v16  ;;  %968 = vmatmul.mubr.msk.bf16.gmra.mrb[8].mxu0 %vm96_vm0, %v1062_v53 }
  0x2c   :  { %376 = vmatpush1.bf16.msra.mxu0 %v1261_v13  ;;  %171 = vmatprep.mubr.bf16.mxu0 %v1171_v0 }
  0x2d   :  { %377 = vmatprep.subr.bf16.mxu0 %v1263_v14 }
  0x2e   :  { %314 = vmatpush1.bf16.msra.mxu1 %v1280_v17 }
  0x2f   :  { %315 = vmatprep.subr.bf16.mxu1 %v1284_v18 }
  0x30   :  { %378 = vmatpush1.bf16.msra.mxu0 %v1270_v15 }
  0x31   :  { %379 = vmatprep.subr.bf16.mxu0 %v1276_v16 }
  0x32   :  { %316 = vmatpush1.bf16.msra.mxu1 %v1288_v19 }
  0x33   :  { %433 = vmatprep.subr.bf16.mxu1 %v1226_v1  ;;  %969 = vmatmul.mubr.msk.bf16.gmra.mrb[12].mxu0 %vm96_vm0, %v1063_v54 }
  0x34   :  { %380 = vmatpush1.bf16.msra.mxu0 %v1280_v17  ;;  %399 = vmatprep.mubr.bf16.mxu0 %v1171_v0 }
  0x35   :  { %334 = vmatmul.mubr.bf16.vlgmr.msra.gmra.mrb[0].mxu1 %v1172_v20  ;;  %381 = vmatprep.subr.bf16.mxu0 %v1284_v18 }
  0x36   :  { %434 = vmatpush1.bf16.msra.mxu1 %v1228_v2  ;;  %465 = vmatprep.mubr.bf16.mxu1 %v1171_v0 }
  0x37   :  { %435 = vmatprep.subr.bf16.mxu1 %v1231_v3 }
  0x38   :  { %382 = vmatpush1.bf16.msra.mxu0 %v1288_v19 }
  0x39   :  { %499 = vmatprep.subr.bf16.mxu0 %v1226_v1 }
  0x3a   :  { %436 = vmatpush1.bf16.msra.mxu1 %v1234_v4 }
  0x3b   :  { %437 = vmatprep.subr.bf16.mxu1 %v1237_v5 }
  0x3e   :  { %438 = vmatpush1.bf16.msra.mxu1 %v1240_v6 }
  0x3f   :  { %439 = vmatprep.subr.bf16.mxu1 %v1242_v7 }
  0x42   :  { %440 = vmatpush1.bf16.msra.mxu1 %v1251_v10 }
  0x43   :  { %441 = vmatprep.subr.bf16.mxu1 %v1258_v12 }
  0x46   :  { %442 = vmatpush1.bf16.msra.mxu1 %v1261_v13 }
  0x47   :  { %443 = vmatprep.subr.bf16.mxu1 %v1263_v14 }
  0x4a   :  { %444 = vmatpush1.bf16.msra.mxu1 %v1270_v15 }
  0x4b   :  { %445 = vmatprep.subr.bf16.mxu1 %v1276_v16 }
  0x4e   :  { %446 = vmatpush1.bf16.msra.mxu1 %v1280_v17 }
  0x4f   :  { %447 = vmatprep.subr.bf16.mxu1 %v1284_v18 }
  0x52   :  { %448 = vmatpush1.bf16.msra.mxu1 %v1288_v19 }
  0x53   :  { %565 = vmatprep.subr.bf16.mxu1 %v1226_v1 }
  0xee   :  { %v143_v21 = vpop.f32.mrb[0].mxu0 }
  0xef   :  { %v145_v23 = vpop.f32.mrb[1].mxu0  ;;  %v144_v32 = vadd.f32 %v143_v21, %v1327_v30 }
  0xf0   :  { %v1320_v24 = vpop.f32.mrb[2].mxu0  ;;  %v146_v33 = vadd.f32 %v145_v23, %v1329_v31 }
  0xf1   :  { %v1322_v25 = vpop.f32.mrb[3].mxu0 }
  0xf6   :  { %v1357_v60 = vpop.f32.mrb[4].mxu0 }
  0xf7   :  { %v1359_v61 = vpop.f32.mrb[5].mxu0 }
  0xf8   :  { %v1361_v62 = vpop.f32.mrb[6].mxu0 }
  0xf9   :  { %v1363_v63 = vpop.f32.mrb[7].mxu0 }
  0xfe   :  { %v1365_v8 = vpop.f32.mrb[8].mxu0 }
  0xff   :  { %v1367_v9 = vpop.f32.mrb[9].mxu0 }
 0x100   :  { %v1369_v11 = vpop.f32.mrb[10].mxu0 }
 0x101   :  { %v1371_v20 = vpop.f32.mrb[11].mxu0 }
 0x106   :  { %v1373_v21 = vpop.f32.mrb[12].mxu0 }
 0x107   :  { %v1375_v22 = vpop.f32.mrb[13].mxu0 }
 0x108   :  { %v335_v35 = vpop.f32.mrb[0].mxu1  ;;  %v1377_v23 = vpop.f32.mrb[14].mxu0 }
 0x109   :  { %v342_v36 = vadd.f32 %v335_v35, %v144_v32  ;;  %v337_v37 = vpop.f32.mrb[1].mxu1  ;;  %v1379_v26 = vpop.f32.mrb[15].mxu0  ;;  %v148_v32 = vadd.f32 %v1320_v24, %v1327_v30 }
 0x10a   :  { %v343_v38 = vadd.f32 %v337_v37, %v146_v33  ;;  %v339_v39 = vpop.f32.mrb[2].mxu1  ;;  %v150_v33 = vadd.f32 %v1322_v25, %v1329_v31 }
 0x10b   :  { %v344_v40 = vmul.f32 0.5, %v342_v36  ;;  %v340_v41 = vpop.f32.mrb[3].mxu1 }
 0x10c   :  { %v348_v42 = vmul.f32 0.5, %v343_v38 }
 0x10d   :  { %1072 = vtanh.f32 %v344_v40 }
 0x10e   :  { %v349_v43 = vsel %vm216_vm1, %v343_v38, %v348_v42 }
 0x10f   :  { %1074 = vtanh.f32 %v349_v43 }
 0x117   :  { %v1073_v44 = vpop.eup %1072 }
 0x118   :  { %v346_v46 = vmul.f32 0.5, %v1073_v44 }
 0x119   :  { %v1075_v45 = vpop.eup %1074 }
 0x11a   :  { %v351_v47 = vmul.f32 0.5, %v1075_v45  ;;  %v347_v49 = vadd.f32 0.5, %v346_v46 }
 0x11c   :  { %v352_v48 = vadd.f32 0.5, %v351_v47  ;;  %v354_v55 = vmul.f32 0.0, %v347_v49 }
 0x11e   :  { %v353_v50 = vsel %vm216_vm1, %v1075_v45, %v352_v48 }
 0x11f   :  { %v355_v51 = vmul.f32 %v353_v50, %v347_v49 }
 0x121   :  { %356 = vrot.lane.b32.xlu0 %v355_v51, %s1173_s3 }
 0x193   :  { %v357_v56 = vpop.permute.xlu0 %356 }
 0x194   :  { %v358_v57 = vadd.f32 %v357_v56, %v354_v55 }
 0x196   :  { %1076 = vtanh.f32 %v358_v57 }
 0x1a0   :  { %v1077_v58 = vpop.eup %1076 }
 0x1a1   :  { %v360_v59 = vmul.f32 %v1077_v58, %v353_v50  ;;  %v154_v58 = vadd.f32 %v1357_v60, %v1327_v30 }
 0x1a3   :  { %361 = vrot.lane.b32.xlu0 %v360_v59, %s1173_s3  ;;  %v156_v59 = vadd.f32 %v1359_v61, %v1329_v31 }
 0x215   :  { %v362_v27 = vpop.permute.xlu0 %361 }
 0x216   :  { %v363_v28 = vsel %vm216_vm1, %v362_v27, %v358_v57 }
 0x217   :  { %v366_v29 = vpack.c.bf16 %v363_v28, %v363_v28 }
 0x219   :  { %400 = vmatmul.mubr.bf16.vlgmr.msra.gmra.mrb[16].mxu0 %v366_v29 }
 0x21a   :  { %500 = vmatpush1.bf16.msra.mxu0 %v1228_v2  ;;  %531 = vmatprep.mubr.bf16.mxu0 %v1171_v0 }
 0x21b   :  { %501 = vmatprep.subr.bf16.mxu0 %v1231_v3 }
 0x21e   :  { %502 = vmatpush1.bf16.msra.mxu0 %v1234_v4 }
 0x21f   :  { %503 = vmatprep.subr.bf16.mxu0 %v1237_v5 }
 0x222   :  { %504 = vmatpush1.bf16.msra.mxu0 %v1240_v6 }
 0x223   :  { %505 = vmatprep.subr.bf16.mxu0 %v1242_v7 }
 0x226   :  { %506 = vmatpush1.bf16.msra.mxu0 %v1251_v10 }
 0x227   :  { %507 = vmatprep.subr.bf16.mxu0 %v1258_v12 }
 0x22a   :  { %508 = vmatpush1.bf16.msra.mxu0 %v1261_v13 }
 0x22b   :  { %509 = vmatprep.subr.bf16.mxu0 %v1263_v14 }
 0x22e   :  { %510 = vmatpush1.bf16.msra.mxu0 %v1270_v15 }
 0x22f   :  { %511 = vmatprep.subr.bf16.mxu0 %v1276_v16 }
 0x232   :  { %512 = vmatpush1.bf16.msra.mxu0 %v1280_v17 }
 0x233   :  { %513 = vmatprep.subr.bf16.mxu0 %v1284_v18 }
 0x236   :  { %514 = vmatpush1.bf16.msra.mxu0 %v1288_v19 }
 0x237   :  { %631 = vmatprep.subr.bf16.mxu0 %v1226_v1 }
 0x2ec   :  { %v401_v35 = vpop.f32.mrb[16].mxu0 }
 0x2ed   :  { %v408_v36 = vadd.f32 %v401_v35, %v148_v32  ;;  %v403_v37 = vpop.f32.mrb[17].mxu0 }
 0x2ee   :  { %v409_v38 = vadd.f32 %v403_v37, %v150_v33  ;;  %v405_v39 = vpop.f32.mrb[18].mxu0 }
 0x2ef   :  { %v410_v40 = vmul.f32 0.5, %v408_v36  ;;  %v406_v41 = vpop.f32.mrb[19].mxu0 }
 0x2f0   :  { %v414_v42 = vmul.f32 0.5, %v409_v38 }
 0x2f1   :  { %1078 = vtanh.f32 %v410_v40 }
 0x2f2   :  { %v415_v43 = vsel %vm216_vm1, %v409_v38, %v414_v42 }
 0x2f3   :  { %1080 = vtanh.f32 %v415_v43 }
 0x2fb   :  { %v1079_v44 = vpop.eup %1078 }
 0x2fc   :  { %v412_v46 = vmul.f32 0.5, %v1079_v44 }
 0x2fd   :  { %v1081_v45 = vpop.eup %1080 }
 0x2fe   :  { %v417_v24 = vmul.f32 0.5, %v1081_v45  ;;  %v413_v48 = vadd.f32 0.5, %v412_v46 }
 0x300   :  { %v418_v47 = vadd.f32 0.5, %v417_v24  ;;  %v420_v50 = vmul.f32 %v413_v48, %v363_v28 }
 0x302   :  { %v419_v25 = vsel %vm216_vm1, %v1081_v45, %v418_v47 }
 0x303   :  { %v421_v49 = vmul.f32 %v419_v25, %v413_v48 }
 0x305   :  { %422 = vrot.lane.b32.xlu1 %v421_v49, %s1173_s3 }
 0x377   :  { %v423_v51 = vpop.permute.xlu1 %422 }
 0x378   :  { %v424_v52 = vadd.f32 %v423_v51, %v420_v50  ;;  %v158_v51 = vadd.f32 %v1361_v62, %v1327_v30 }
 0x37a   :  { %1082 = vtanh.f32 %v424_v52 }
 0x384   :  { %v1083_v53 = vpop.eup %1082 }
 0x385   :  { %v426_v54 = vmul.f32 %v1083_v53, %v419_v25 }
 0x387   :  { %427 = vrot.lane.b32.xlu1 %v426_v54, %s1173_s3 }
 0x3f9   :  { %v428_v55 = vpop.permute.xlu1 %427 }
 0x3fa   :  { %v429_v56 = vsel %vm216_vm1, %v428_v55, %v424_v52  ;;  %v160_v52 = vadd.f32 %v1363_v63, %v1329_v31 }
 0x3fb   :  { %v432_v57 = vpack.c.bf16 %v429_v56, %v429_v56 }
 0x3fd   :  { %466 = vmatmul.mubr.bf16.vlgmr.msra.gmra.mrb[4].mxu1 %v432_v57 }
 0x3fe   :  { %566 = vmatpush1.bf16.msra.mxu1 %v1228_v2  ;;  %597 = vmatprep.mubr.bf16.mxu1 %v1171_v0 }
 0x3ff   :  { %567 = vmatprep.subr.bf16.mxu1 %v1231_v3 }
 0x402   :  { %568 = vmatpush1.bf16.msra.mxu1 %v1234_v4 }
 0x403   :  { %569 = vmatprep.subr.bf16.mxu1 %v1237_v5 }
 0x406   :  { %570 = vmatpush1.bf16.msra.mxu1 %v1240_v6 }
 0x407   :  { %571 = vmatprep.subr.bf16.mxu1 %v1242_v7 }
 0x40a   :  { %572 = vmatpush1.bf16.msra.mxu1 %v1251_v10 }
 0x40b   :  { %573 = vmatprep.subr.bf16.mxu1 %v1258_v12 }
 0x40e   :  { %574 = vmatpush1.bf16.msra.mxu1 %v1261_v13 }
 0x40f   :  { %575 = vmatprep.subr.bf16.mxu1 %v1263_v14 }
 0x412   :  { %576 = vmatpush1.bf16.msra.mxu1 %v1270_v15 }
 0x413   :  { %577 = vmatprep.subr.bf16.mxu1 %v1276_v16 }
 0x416   :  { %578 = vmatpush1.bf16.msra.mxu1 %v1280_v17 }
 0x417   :  { %579 = vmatprep.subr.bf16.mxu1 %v1284_v18 }
 0x41a   :  { %580 = vmatpush1.bf16.msra.mxu1 %v1288_v19 }
 0x41b   :  { %697 = vmatprep.subr.bf16.mxu1 %v1226_v1 }
 0x4d0   :  { %v467_v27 = vpop.f32.mrb[4].mxu1 }
 0x4d1   :  { %v474_v28 = vadd.f32 %v467_v27, %v154_v58  ;;  %v469_v29 = vpop.f32.mrb[5].mxu1 }
 0x4d2   :  { %v475_v32 = vadd.f32 %v469_v29, %v156_v59  ;;  %v471_v33 = vpop.f32.mrb[6].mxu1 }
 0x4d3   :  { %v476_v35 = vmul.f32 0.5, %v474_v28  ;;  %v472_v36 = vpop.f32.mrb[7].mxu1 }
 0x4d4   :  { %v480_v37 = vmul.f32 0.5, %v475_v32 }
 0x4d5   :  { %1084 = vtanh.f32 %v476_v35 }
 0x4d6   :  { %v481_v38 = vsel %vm216_vm1, %v475_v32, %v480_v37 }
 0x4d7   :  { %1086 = vtanh.f32 %v481_v38 }
 0x4df   :  { %v1085_v39 = vpop.eup %1084 }
 0x4e0   :  { %v478_v41 = vmul.f32 0.5, %v1085_v39 }
 0x4e1   :  { %v1087_v40 = vpop.eup %1086 }
 0x4e2   :  { %v483_v60 = vmul.f32 0.5, %v1087_v40  ;;  %v479_v43 = vadd.f32 0.5, %v478_v41 }
 0x4e4   :  { %v484_v42 = vadd.f32 0.5, %v483_v60  ;;  %v486_v45 = vmul.f32 %v479_v43, %v429_v56 }
 0x4e6   :  { %v485_v61 = vsel %vm216_vm1, %v1087_v40, %v484_v42 }
 0x4e7   :  { %v487_v44 = vmul.f32 %v485_v61, %v479_v43 }
 0x4e9   :  { %488 = vrot.lane.b32.xlu0 %v487_v44, %s1173_s3  ;;  %v166_v44 = vadd.f32 %v1367_v9, %v1329_v31 }
 0x55b   :  { %v489_v46 = vpop.permute.xlu0 %488 }
 0x55c   :  { %v490_v24 = vadd.f32 %v489_v46, %v486_v45 }
 0x55e   :  { %1088 = vtanh.f32 %v490_v24 }
 0x568   :  { %v1089_v47 = vpop.eup %1088 }
 0x569   :  { %v492_v48 = vmul.f32 %v1089_v47, %v485_v61  ;;  %v164_v61 = vadd.f32 %v1365_v8, %v1327_v30 }
 0x56b   :  { %493 = vrot.lane.b32.xlu1 %v492_v48, %s1173_s3 }
 0x5dd   :  { %v494_v25 = vpop.permute.xlu1 %493 }
 0x5de   :  { %v495_v49 = vsel %vm216_vm1, %v494_v25, %v490_v24 }
 0x5df   :  { %v498_v50 = vpack.c.bf16 %v495_v49, %v495_v49 }
 0x5e1   :  { %532 = vmatmul.mubr.bf16.vlgmr.msra.gmra.mrb[20].mxu0 %v498_v50 }
 0x5e2   :  { %632 = vmatpush1.bf16.msra.mxu0 %v1228_v2  ;;  %663 = vmatprep.mubr.bf16.mxu0 %v1171_v0 }
 0x5e3   :  { %633 = vmatprep.subr.bf16.mxu0 %v1231_v3 }
 0x5e6   :  { %634 = vmatpush1.bf16.msra.mxu0 %v1234_v4 }
 0x5e7   :  { %635 = vmatprep.subr.bf16.mxu0 %v1237_v5 }
 0x5ea   :  { %636 = vmatpush1.bf16.msra.mxu0 %v1240_v6 }
 0x5eb   :  { %637 = vmatprep.subr.bf16.mxu0 %v1242_v7 }
 0x5ee   :  { %638 = vmatpush1.bf16.msra.mxu0 %v1251_v10 }
 0x5ef   :  { %639 = vmatprep.subr.bf16.mxu0 %v1258_v12 }
 0x5f2   :  { %640 = vmatpush1.bf16.msra.mxu0 %v1261_v13 }
 0x5f3   :  { %641 = vmatprep.subr.bf16.mxu0 %v1263_v14 }
 0x5f6   :  { %642 = vmatpush1.bf16.msra.mxu0 %v1270_v15 }
 0x5f7   :  { %643 = vmatprep.subr.bf16.mxu0 %v1276_v16 }
 0x5fa   :  { %644 = vmatpush1.bf16.msra.mxu0 %v1280_v17 }
 0x5fb   :  { %645 = vmatprep.subr.bf16.mxu0 %v1284_v18 }
 0x5fe   :  { %646 = vmatpush1.bf16.msra.mxu0 %v1288_v19 }
 0x5ff   :  { %763 = vmatprep.subr.bf16.mxu0 %v1226_v1 }
 0x6b4   :  { %v533_v53 = vpop.f32.mrb[20].mxu0 }
 0x6b5   :  { %v540_v54 = vadd.f32 %v533_v53, %v158_v51  ;;  %v535_v55 = vpop.f32.mrb[21].mxu0 }
 0x6b6   :  { %v541_v56 = vadd.f32 %v535_v55, %v160_v52  ;;  %v537_v57 = vpop.f32.mrb[22].mxu0 }
 0x6b7   :  { %v542_v58 = vmul.f32 0.5, %v540_v54  ;;  %v538_v59 = vpop.f32.mrb[23].mxu0 }
 0x6b8   :  { %v546_v27 = vmul.f32 0.5, %v541_v56 }
 0x6b9   :  { %1090 = vtanh.f32 %v542_v58 }
 0x6ba   :  { %v547_v28 = vsel %vm216_vm1, %v541_v56, %v546_v27 }
 0x6bb   :  { %1092 = vtanh.f32 %v547_v28 }
 0x6c3   :  { %v1091_v1 = vpop.eup %1090 }
 0x6c4   :  { %v544_v32 = vmul.f32 0.5, %v1091_v1 }
 0x6c5   :  { %v1093_v29 = vpop.eup %1092 }
 0x6c6   :  { %v549_v62 = vmul.f32 0.5, %v1093_v29  ;;  %v545_v35 = vadd.f32 0.5, %v544_v32 }
 0x6c8   :  { %v550_v33 = vadd.f32 0.5, %v549_v62  ;;  %v552_v37 = vmul.f32 %v545_v35, %v495_v49 }
 0x6ca   :  { %v551_v63 = vsel %vm216_vm1, %v1093_v29, %v550_v33 }
 0x6cb   :  { %v553_v36 = vmul.f32 %v551_v63, %v545_v35 }
 0x6cd   :  { %554 = vrot.lane.b32.xlu0 %v553_v36, %s1173_s3 }
 0x73f   :  { %v555_v38 = vpop.permute.xlu0 %554 }
 0x740   :  { %v556_v39 = vadd.f32 %v555_v38, %v552_v37 }
 0x742   :  { %1094 = vtanh.f32 %v556_v39 }
 0x74c   :  { %v1095_v40 = vpop.eup %1094 }
 0x74d   :  { %v558_v41 = vmul.f32 %v1095_v40, %v551_v63 }
 0x74f   :  { %559 = vrot.lane.b32.xlu1 %v558_v41, %s1173_s3 }
 0x7c1   :  { %v560_v60 = vpop.permute.xlu1 %559 }
 0x7c2   :  { %v561_v42 = vsel %vm216_vm1, %v560_v60, %v556_v39  ;;  %v174_v60 = vadd.f32 %v1373_v21, %v1327_v30 }
 0x7c3   :  { %v564_v43 = vpack.c.bf16 %v561_v42, %v561_v42 }
 0x7c5   :  { %598 = vmatmul.mubr.bf16.vlgmr.msra.gmra.mrb[8].mxu1 %v564_v43 }
 0x7c6   :  { %698 = vmatpush1.bf16.msra.mxu1 %v1228_v2  ;;  %729 = vmatprep.mubr.bf16.mxu1 %v1171_v0 }
 0x7c7   :  { %699 = vmatprep.subr.bf16.mxu1 %v1231_v3 }
 0x7ca   :  { %700 = vmatpush1.bf16.msra.mxu1 %v1234_v4 }
 0x7cb   :  { %701 = vmatprep.subr.bf16.mxu1 %v1237_v5 }
 0x7ce   :  { %702 = vmatpush1.bf16.msra.mxu1 %v1240_v6 }
 0x7cf   :  { %703 = vmatprep.subr.bf16.mxu1 %v1242_v7 }
 0x7d2   :  { %704 = vmatpush1.bf16.msra.mxu1 %v1251_v10 }
 0x7d3   :  { %705 = vmatprep.subr.bf16.mxu1 %v1258_v12 }
 0x7d6   :  { %706 = vmatpush1.bf16.msra.mxu1 %v1261_v13 }
 0x7d7   :  { %707 = vmatprep.subr.bf16.mxu1 %v1263_v14 }
 0x7da   :  { %708 = vmatpush1.bf16.msra.mxu1 %v1270_v15 }
 0x7db   :  { %709 = vmatprep.subr.bf16.mxu1 %v1276_v16 }
 0x7de   :  { %710 = vmatpush1.bf16.msra.mxu1 %v1280_v17 }
 0x7df   :  { %711 = vmatprep.subr.bf16.mxu1 %v1284_v18 }
 0x7e2   :  { %712 = vmatpush1.bf16.msra.mxu1 %v1288_v19 }
 0x898   :  { %v599_v45 = vpop.f32.mrb[8].mxu1 }
 0x899   :  { %v606_v46 = vadd.f32 %v599_v45, %v164_v61  ;;  %v601_v24 = vpop.f32.mrb[9].mxu1 }
 0x89a   :  { %v607_v47 = vadd.f32 %v601_v24, %v166_v44  ;;  %v603_v48 = vpop.f32.mrb[10].mxu1 }
 0x89b   :  { %v608_v25 = vmul.f32 0.5, %v606_v46  ;;  %v604_v49 = vpop.f32.mrb[11].mxu1 }
 0x89c   :  { %v612_v50 = vmul.f32 0.5, %v607_v47 }
 0x89d   :  { %1096 = vtanh.f32 %v608_v25 }
 0x89e   :  { %v613_v51 = vsel %vm216_vm1, %v607_v47, %v612_v50 }
 0x89f   :  { %1098 = vtanh.f32 %v613_v51 }
 0x8a7   :  { %v1097_v52 = vpop.eup %1096 }
 0x8a8   :  { %v610_v54 = vmul.f32 0.5, %v1097_v52 }
 0x8a9   :  { %v1099_v53 = vpop.eup %1098 }
 0x8aa   :  { %v615_v8 = vmul.f32 0.5, %v1099_v53  ;;  %v611_v56 = vadd.f32 0.5, %v610_v54 }
 0x8ac   :  { %v616_v55 = vadd.f32 0.5, %v615_v8  ;;  %v618_v58 = vmul.f32 %v611_v56, %v561_v42  ;;  %v176_v42 = vadd.f32 %v1375_v22, %v1329_v31 }
 0x8ae   :  { %v617_v9 = vsel %vm216_vm1, %v1099_v53, %v616_v55 }
 0x8af   :  { %v619_v57 = vmul.f32 %v617_v9, %v611_v56 }
 0x8b1   :  { %620 = vrot.lane.b32.xlu0 %v619_v57, %s1173_s3 }
 0x923   :  { %v621_v59 = vpop.permute.xlu0 %620 }
 0x924   :  { %v622_v27 = vadd.f32 %v621_v59, %v618_v58 }
 0x926   :  { %1100 = vtanh.f32 %v622_v27 }
 0x930   :  { %v1101_v28 = vpop.eup %1100 }
 0x931   :  { %v624_v1 = vmul.f32 %v1101_v28, %v617_v9  ;;  %v178_v28 = vadd.f32 %v1377_v23, %v1327_v30 }
 0x933   :  { %625 = vrot.lane.b32.xlu1 %v624_v1, %s1173_s3  ;;  %v180_v1 = vadd.f32 %v1379_v26, %v1329_v31 }
 0x9a5   :  { %v626_v29 = vpop.permute.xlu1 %625 }
 0x9a6   :  { %v627_v32 = vsel %vm216_vm1, %v626_v29, %v622_v27 }
 0x9a7   :  { %v630_v62 = vpack.c.bf16 %v627_v32, %v627_v32 }
 0x9a9   :  { %664 = vmatmul.mubr.bf16.vlgmr.msra.gmra.mrb[24].mxu0 %v630_v62 }
 0x9aa   :  { %764 = vmatpush1.bf16.msra.mxu0 %v1228_v2  ;;  %795 = vmatprep.mubr.bf16.mxu0 %v1171_v0  ;;  %v168_v0 = vadd.f32 %v1369_v11, %v1327_v30  ;;  %v170_v2 = vadd.f32 %v1371_v20, %v1329_v31 }
 0x9ab   :  { %765 = vmatprep.subr.bf16.mxu0 %v1231_v3 }
 0x9ae   :  { %766 = vmatpush1.bf16.msra.mxu0 %v1234_v4 }
 0x9af   :  { %767 = vmatprep.subr.bf16.mxu0 %v1237_v5 }
 0x9b2   :  { %768 = vmatpush1.bf16.msra.mxu0 %v1240_v6 }
 0x9b3   :  { %769 = vmatprep.subr.bf16.mxu0 %v1242_v7 }
 0x9b6   :  { %770 = vmatpush1.bf16.msra.mxu0 %v1251_v10 }
 0x9b7   :  { %771 = vmatprep.subr.bf16.mxu0 %v1258_v12 }
 0x9ba   :  { %772 = vmatpush1.bf16.msra.mxu0 %v1261_v13 }
 0x9bb   :  { %773 = vmatprep.subr.bf16.mxu0 %v1263_v14 }
 0x9be   :  { %774 = vmatpush1.bf16.msra.mxu0 %v1270_v15 }
 0x9bf   :  { %775 = vmatprep.subr.bf16.mxu0 %v1276_v16 }
 0x9c2   :  { %776 = vmatpush1.bf16.msra.mxu0 %v1280_v17 }
 0x9c3   :  { %777 = vmatprep.subr.bf16.mxu0 %v1284_v18 }
 0x9c6   :  { %778 = vmatpush1.bf16.msra.mxu0 %v1288_v19 }
 0xa7c   :  { %v665_v3 = vpop.f32.mrb[24].mxu0 }
 0xa7d   :  { %v672_v4 = vadd.f32 %v665_v3, %v168_v0  ;;  %v667_v5 = vpop.f32.mrb[25].mxu0 }
 0xa7e   :  { %v673_v6 = vadd.f32 %v667_v5, %v170_v2  ;;  %v669_v7 = vpop.f32.mrb[26].mxu0 }
 0xa7f   :  { %v674_v10 = vmul.f32 0.5, %v672_v4  ;;  %v670_v12 = vpop.f32.mrb[27].mxu0 }
 0xa80   :  { %v678_v13 = vmul.f32 0.5, %v673_v6 }
 0xa81   :  { %1102 = vtanh.f32 %v674_v10 }
 0xa82   :  { %v679_v14 = vsel %vm216_vm1, %v673_v6, %v678_v13 }
 0xa83   :  { %1104 = vtanh.f32 %v679_v14  ;;  %v1064_v14 = vld [vmem:[%s1593_s4] sm:$0xff]  }
 0xa8b   :  { %v1103_v15 = vpop.eup %1102 }
 0xa8c   :  { %v676_v17 = vmul.f32 0.5, %v1103_v15  ;;  %v1174_v15 = vmov 0.0  }
 0xa8d   :  { %v1105_v16 = vpop.eup %1104  ;;  %1004 = vmatprep.subr.bf16.mxu1 %v1174_v15 }
 0xa8e   :  { %v681_v18 = vmul.f32 0.5, %v1105_v16  ;;  %v677_v11 = vadd.f32 0.5, %v676_v17  ;;  %v1066_v17 = vld [vmem:[%s1593_s4 + $0x10] sm:$0xff]  }
 0xa90   :  { %v682_v19 = vadd.f32 0.5, %v681_v18  ;;  %v684_v35 = vmul.f32 %v677_v11, %v627_v32  ;;  %v1067_v18 = vld [vmem:[%s1593_s4 + $0x18] sm:$0xff]  }
 0xa92   :  { %v683_v20 = vsel %vm216_vm1, %v1105_v16, %v682_v19  ;;  %v1065_v16 = vld [vmem:[%s1593_s4 + $0x8] sm:$0xff]   ;;  %v1068_v19 = vld [vmem:[%s1593_s4 + $0x20] sm:$0xff]  }
 0xa93   :  { %v685_v33 = vmul.f32 %v683_v20, %v677_v11  ;;  %v1069_v11 = vld [vmem:[%s1593_s4 + $0x28] sm:$0xff]  }
 0xa95   :  { %686 = vrot.lane.b32.xlu0 %v685_v33, %s1173_s3 }
 0xb07   :  { %v687_v63 = vpop.permute.xlu0 %686 }
 0xb08   :  { %v688_v36 = vadd.f32 %v687_v63, %v684_v35 }
 0xb0a   :  { %1106 = vtanh.f32 %v688_v36 }
 0xb14   :  { %v1107_v37 = vpop.eup %1106 }
 0xb15   :  { %v690_v38 = vmul.f32 %v1107_v37, %v683_v20  ;;  %v1070_v20 = vld [vmem:[%s1593_s4 + $0x30] sm:$0xff]  }
 0xb17   :  { %691 = vrot.lane.b32.xlu1 %v690_v38, %s1173_s3 }
 0xb89   :  { %v692_v39 = vpop.permute.xlu1 %691 }
 0xb8a   :  { %v693_v40 = vsel %vm216_vm1, %v692_v39, %v688_v36  ;;  %v1071_v36 = vld [vmem:[%s1593_s4 + $0x38] sm:$0xff]   ;;  %s951_s4 = sshll.u32 %s1176_s15, 4  ;;  %s952_s4 = int_to_ptr.vmem [resolvable:$true] %s951_s4 }
 0xb8b   :  { %v696_v41 = vpack.c.bf16 %v693_v40, %v693_v40  ;;  %s1142_s1 = scalar_lea.vmem %s952_s4, 128  ;;  %p1147_p9 = scmp.lt.s32.totalorder %s952_s4, %s952_s4 }
 0xb8c   :  { %p1143_p8 = scmp.ne.s32.totalorder %s952_s4, %s1142_s1  ;;  %p1148_p10 = scmp.lt.s32.totalorder %s1142_s1, %s1142_s1 }
 0xb8d   :  { %730 = vmatmul.mubr.bf16.vlgmr.msra.gmra.mrb[12].mxu1 %v696_v41 }
 0xb8e   :  { %1005 = vmatpush3.bf16.msra.mxu1 %v1064_v14  ;;  %1020 = vmatprep.mubr.msk.bf16.mxu1 %vm1175_vm2, %v1174_v15  ;;  %p1149_p11 = por %p1148_p10, %p1147_p9 }
 0xb8f   :  { %1006 = vmatprep.subr.bf16.mxu1 %v1174_v15 }
 0xb90   :  { %p1150_p12 = pnand %p1149_p11, %p1143_p8 }
 0xb92   :  { %1007 = vmatpush3.bf16.msra.mxu1 %v1065_v16 }
 0xb93   :  { %1008 = vmatprep.subr.bf16.mxu1 %v1174_v15 }
 0xb96   :  { %1009 = vmatpush3.bf16.msra.mxu1 %v1066_v17 }
 0xb97   :  { %1010 = vmatprep.subr.bf16.mxu1 %v1174_v15 }
 0xb9a   :  { %1011 = vmatpush3.bf16.msra.mxu1 %v1067_v18 }
 0xb9b   :  { %1012 = vmatprep.subr.bf16.mxu1 %v1174_v15 }
 0xb9e   :  { %1013 = vmatpush3.bf16.msra.mxu1 %v1068_v19 }
 0xb9f   :  { %1014 = vmatprep.subr.bf16.mxu1 %v1174_v15 }
 0xba2   :  { %1015 = vmatpush3.bf16.msra.mxu1 %v1069_v11 }
 0xba3   :  { %1016 = vmatprep.subr.bf16.mxu1 %v1174_v15 }
 0xba6   :  { %1017 = vmatpush3.bf16.msra.mxu1 %v1070_v20 }
 0xba7   :  { %1018 = vmatprep.subr.bf16.mxu1 %v1174_v15 }
 0xbaa   :  { %1019 = vmatpush3.bf16.msra.mxu1 %v1071_v36 }
 0xc60   :  { %v731_v43 = vpop.f32.mrb[12].mxu1 }
 0xc61   :  { %v738_v61 = vadd.f32 %v731_v43, %v174_v60  ;;  %v733_v44 = vpop.f32.mrb[13].mxu1  ;;  %v986_v60 = vld [vmem:[%s1594_s5] ss:$0 sm:$0xff] }
 0xc62   :  { %v739_v45 = vadd.f32 %v733_v44, %v176_v42  ;;  %v735_v46 = vpop.f32.mrb[14].mxu1 }
 0xc63   :  { %v740_v24 = vmul.f32 0.5, %v738_v61  ;;  %v736_v47 = vpop.f32.mrb[15].mxu1 }
 0xc64   :  { %v744_v48 = vmul.f32 0.5, %v739_v45 }
 0xc65   :  { %1108 = vtanh.f32 %v740_v24 }
 0xc66   :  { %v745_v25 = vsel %vm216_vm1, %v739_v45, %v744_v48 }
 0xc67   :  { %1110 = vtanh.f32 %v745_v25 }
 0xc6f   :  { %v1109_v49 = vpop.eup %1108 }
 0xc70   :  { %v742_v51 = vmul.f32 0.5, %v1109_v49 }
 0xc71   :  { %v1111_v50 = vpop.eup %1110 }
 0xc72   :  { %v747_v21 = vmul.f32 0.5, %v1111_v50  ;;  %v743_v53 = vadd.f32 0.5, %v742_v51 }
 0xc74   :  { %v748_v52 = vadd.f32 0.5, %v747_v21  ;;  %v750_v8 = vmul.f32 %v743_v53, %v693_v40 }
 0xc76   :  { %v749_v22 = vsel %vm216_vm1, %v1111_v50, %v748_v52 }
 0xc77   :  { %v751_v54 = vmul.f32 %v749_v22, %v743_v53 }
 0xc79   :  { %752 = vrot.lane.b32.xlu0 %v751_v54, %s1173_s3 }
 0xceb   :  { %v753_v55 = vpop.permute.xlu0 %752 }
 0xcec   :  { %v754_v56 = vadd.f32 %v753_v55, %v750_v8 }
 0xcee   :  { %1112 = vtanh.f32 %v754_v56 }
 0xcf8   :  { %v1113_v9 = vpop.eup %1112 }
 0xcf9   :  { %v756_v57 = vmul.f32 %v1113_v9, %v749_v22 }
 0xcfb   :  { %757 = vrot.lane.b32.xlu1 %v756_v57, %s1173_s3 }
 0xd6d   :  { %v758_v58 = vpop.permute.xlu1 %757 }
 0xd6e   :  { %v759_v59 = vsel %vm216_vm1, %v758_v58, %v754_v56 }
 0xd6f   :  { %v762_v27 = vpack.c.bf16 %v759_v59, %v759_v59 }
 0xd71   :  { %796 = vmatmul.mubr.bf16.vlgmr.msra.gmra.mrb[28].mxu0 %v762_v27 }
 0xe44   :  { %v797_v29 = vpop.f32.mrb[28].mxu0 }
 0xe45   :  { %v804_v32 = vadd.f32 %v797_v29, %v178_v28  ;;  %v799_v62 = vpop.f32.mrb[29].mxu0 }
 0xe46   :  { %v805_v0 = vadd.f32 %v799_v62, %v180_v1  ;;  %v801_v2 = vpop.f32.mrb[30].mxu0 }
 0xe47   :  { %v806_v3 = vmul.f32 0.5, %v804_v32  ;;  %v802_v4 = vpop.f32.mrb[31].mxu0 }
 0xe48   :  { %v810_v5 = vmul.f32 0.5, %v805_v0 }
 0xe49   :  { %1114 = vtanh.f32 %v806_v3 }
 0xe4a   :  { %v811_v6 = vsel %vm216_vm1, %v805_v0, %v810_v5 }
 0xe4b   :  { %1116 = vtanh.f32 %v811_v6 }
 0xe53   :  { %v1115_v7 = vpop.eup %1114 }
 0xe54   :  { %v808_v12 = vmul.f32 0.5, %v1115_v7 }
 0xe55   :  { %v1117_v10 = vpop.eup %1116 }
 0xe56   :  { %v813_v30 = vmul.f32 0.5, %v1117_v10  ;;  %v809_v13 = vadd.f32 0.5, %v808_v12 }
 0xe58   :  { %v814_v23 = vadd.f32 0.5, %v813_v30  ;;  %v816_v33 = vmul.f32 %v809_v13, %v759_v59 }
 0xe5a   :  { %v815_v31 = vsel %vm216_vm1, %v1117_v10, %v814_v23 }
 0xe5b   :  { %v817_v26 = vmul.f32 %v815_v31, %v809_v13 }
 0xe5d   :  { %818 = vrot.lane.b32.xlu0 %v817_v26, %s1173_s3 }
 0xecf   :  { %v819_v35 = vpop.permute.xlu0 %818 }
 0xed0   :  { %v820_v63 = vadd.f32 %v819_v35, %v816_v33 }
 0xed2   :  { %1118 = vtanh.f32 %v820_v63 }
 0xedc   :  { %v1119_v37 = vpop.eup %1118 }
 0xedd   :  { %v822_v38 = vmul.f32 %v1119_v37, %v815_v31 }
 0xedf   :  { %823 = vrot.lane.b32.xlu1 %v822_v38, %s1173_s3 }
 0xf51   :  { %v824_v39 = vpop.permute.xlu1 %823 }
 0xf52   :  { %v825_v40 = vsel %vm216_vm1, %v824_v39, %v820_v63 }
 0xf53   :  { %v831_v41 = vpack.c.bf16 %v825_v40, %v825_v40 }
 0xf55   :  { %1021 = vmatmul.mubr.bf16.vlgmr.msra.gmra.mrb[16].mxu1 %v831_v41 }
0x1028   :  { %v937_v42 = vpop.f32.mrb[16].mxu1 }
0x1029   :  { %v938_v43 = vadd.f32 %v986_v60, %v937_v42  ;;  %v1022_v61 = vpop.f32.mrb[17].mxu1 }
0x102a   :  { %v940_v44 = vpop.f32.mrb[18].mxu1 }
0x102b   :  { %v1023_v45 = vpop.f32.mrb[19].mxu1  ;;  %944 = vst.msk [vmem:[#allocation7] sm:$0xff] %vm943_vm3, %v938_v43 }
0x102c   :  { %1153 = shalt.err (!%p1150_p12)
}
0x102d   :  { %s1154_s5 = scalar_lea.hbm %s1595_s6, 128 }
0x102e   :  { %p1155_p13 = scmp.ne.s32.totalorder %s1595_s6, %s1154_s5  ;;  %p1158_p0 = scmp.lt.u32.totalorder %s1154_s5, %s1595_s6 }
0x1030   :  { %p1160_p1 = pnand %p1158_p0, %p1155_p13 }
0x1032   :  { %1163 = shalt.err (!%p1160_p1)
}
0x1033   :  { %954 = dma.vmem_to_hbm [thread:$0]  %s952_s4, 128, %s1595_s6, [#allocation6]  }
0x1034   :  { %1166 = dma.done.wait [#allocation6], 128  }
0x1035   :  { %1167 = vsyncadd [#allocation6], 4294967168 }
0x1036   :  { %958 = vsyncpa [#allocation5], 1 }
0x1037   :  { %959 = vsyncpa [#allocation6], 1 }

</bundles_post_ra>
